<compile_context>
chip_gen: v7x
topology: tpu7x:2x2x1
jax: 0.10.0
libtpu: 0.0.40
codegen_flags: <defaults>
</compile_context>

<pallas_src>
import functools

import jax
import jax.numpy as jnp
from jax.experimental import pallas as pl
from jax.experimental.pallas import tpu as pltpu

DROPOUT_P = 0.2
KEEP_P = 1.0 - DROPOUT_P


def ffn_kernel(*refs, training: bool):
    """Fused dropout(relu(x @ W1 + b1) @ W2 + b2) for one row tile.

    Grid is 1-D over row tiles; W1/W2/b1/b2 blocks are resident in VMEM.
    """
    if training:
        x_ref, w1_ref, b1_ref, w2_ref, b2_ref, u_ref, o_ref = refs
    else:
        x_ref, w1_ref, b1_ref, w2_ref, b2_ref, o_ref = refs
        u_ref = None

    # First linear: bf16 MXU operands, f32 accumulation; bias + ReLU in f32.
    h = jnp.dot(x_ref[...].astype(jnp.bfloat16), w1_ref[...],
                preferred_element_type=jnp.float32)
    h = jnp.maximum(h + b1_ref[...], 0.0)

    # Second linear + bias (f32 accumulate).
    y = jnp.dot(h.astype(jnp.bfloat16), w2_ref[...],
                preferred_element_type=jnp.float32)
    y = y + b2_ref[...]

    if training:
        # Inverted dropout with a pre-sampled uniform tile (pure VPU ops).
        # On a TPU-only deployment this mask could be regenerated in-kernel with
        # pltpu.prng_random_bits to save the mask's HBM read.
        y = jnp.where(u_ref[...] < KEEP_P, y * (1.0 / KEEP_P), 0.0)

    o_ref[...] = y.astype(o_ref.dtype)


@functools.partial(jax.jit, static_argnames=("training",))
def feed_forward(x, w1, b1, w2, b2, *, key=None, training=False):
    """x: (B, T, C). w1: (C, 4C), b1: (4C,), w2: (4C, C), b2: (C,).

    Weights are stored (in, out), i.e. transposed relative to PyTorch nn.Linear.
    """
    B, T, C = x.shape
    H = w1.shape[1]
    M = B * T

    x2 = x.reshape(M, C)
    w1 = w1.astype(jnp.bfloat16)            # bf16 weight streaming (no-op if already bf16)
    w2 = w2.astype(jnp.bfloat16)
    b1_2 = b1.reshape(1, H).astype(jnp.float32)
    b2_2 = b2.reshape(1, C).astype(jnp.float32)

    # Row tile: full extent for small M, 512 (multiple of 8) otherwise.
    # For M > 512 the grid is >= 2, so the parallel axis can use both v7x TCs.
    TM = M if M <= 512 else 512
    grid = (pl.cdiv(M, TM),)

    in_specs = [
        pl.BlockSpec((TM, C), lambda i: (i, 0)),   # x row tile (pipelined)
        pl.BlockSpec((C, H), lambda i: (0, 0)),    # W1 resident in VMEM
        pl.BlockSpec((1, H), lambda i: (0, 0)),    # b1 resident
        pl.BlockSpec((H, C), lambda i: (0, 0)),    # W2 resident
        pl.BlockSpec((1, C), lambda i: (0, 0)),    # b2 resident
    ]
    args = [x2, w1, b1_2, w2, b2_2]

    if training:
        if key is None:
            raise ValueError("training=True requires a PRNG `key`")
        u = jax.random.uniform(key, (M, C), jnp.float32)
        in_specs.append(pl.BlockSpec((TM, C), lambda i: (i, 0)))  # dropout uniforms
        args.append(u)

    flops = 4 * M * C * H                                   # two matmuls
    bytes_accessed = (4 * M * C * (3 if training else 2)    # x read, out write, (mask)
                      + 2 * (2 * C * H)                     # bf16 weights, loaded once
                      + 4 * (H + C))                        # biases

    out = pl.pallas_call(
        functools.partial(ffn_kernel, training=training),
        out_shape=jax.ShapeDtypeStruct((M, C), x.dtype),
        grid=grid,
        in_specs=in_specs,
        out_specs=pl.BlockSpec((TM, C), lambda i: (i, 0)),
        compiler_params=pltpu.CompilerParams(
            dimension_semantics=("parallel",)),
        cost_estimate=pl.CostEstimate(
            flops=flops, transcendentals=0, bytes_accessed=bytes_accessed),
    )(*args)
    return out.reshape(B, T, C)


def init_params(key, n_embd):
    """Init matching nn.Linear's U(-1/sqrt(fan_in), 1/sqrt(fan_in)); weights kept bf16 at rest."""
    hidden = 4 * n_embd
    k1, k2, k3, k4 = jax.random.split(key, 4)
    lim1 = 1.0 / (n_embd ** 0.5)
    lim2 = 1.0 / (hidden ** 0.5)
    # Stored as (in, out), i.e. transposed relative to PyTorch's (out, in).
    w1 = jax.random.uniform(k1, (n_embd, hidden), jnp.float32, -lim1, lim1)
    b1 = jax.random.uniform(k2, (hidden,), jnp.float32, -lim1, lim1)
    w2 = jax.random.uniform(k3, (hidden, n_embd), jnp.float32, -lim2, lim2)
    b2 = jax.random.uniform(k4, (n_embd,), jnp.float32, -lim2, lim2)
    return w1.astype(jnp.bfloat16), b1, w2.astype(jnp.bfloat16), b2


if __name__ == "__main__":
    # batch=2, seq=8, n_embd=384 (hidden = 4*384 = 1536), as implied by the module.
    B, T, C = 2, 8, 384

    key = jax.random.PRNGKey(0)
    k_x, k_p, k_drop = jax.random.split(key, 3)
    x = jax.random.normal(k_x, (B, T, C), jnp.float32)
    w1, b1, w2, b2 = init_params(k_p, C)

    # Eval-mode run (dropout is identity) — deterministic, checkable.
    y_eval = feed_forward(x, w1, b1, w2, b2, training=False)
    jax.block_until_ready(y_eval)

    # Pure-JAX reference for the eval path (same bf16 operands / f32 accumulation).
    x2 = x.reshape(-1, C)
    h_ref = jnp.maximum(
        jnp.dot(x2.astype(jnp.bfloat16), w1,
                preferred_element_type=jnp.float32) + b1, 0.0)
    ref = jnp.dot(h_ref.astype(jnp.bfloat16), w2,
                  preferred_element_type=jnp.float32) + b2
    err = float(jnp.max(jnp.abs(y_eval.reshape(-1, C) - ref)))
    assert jnp.allclose(y_eval.reshape(-1, C), ref, atol=2e-2, rtol=2e-2), err

    # Train-mode run (dropout mask sampled in wrapper, applied in-kernel).
    y_train = feed_forward(x, w1, b1, w2, b2, key=k_drop, training=True)
    jax.block_until_ready(y_train)
    assert y_train.shape == (B, T, C)

    # Dropout sanity: survivors equal y_eval / keep_p, drop fraction ~= 0.2.
    nz = y_train != 0
    assert jnp.allclose(jnp.where(nz, y_train, 0.0),
                        jnp.where(nz, y_eval / KEEP_P, 0.0),
                        atol=2e-2, rtol=2e-2)
    drop_frac = float(1.0 - jnp.mean(nz.astype(jnp.float32)))
    assert 0.05 < drop_frac < 0.4, drop_frac

    print("KERNEL_OK")
</pallas_src>

<mosaic_0001>
module attributes {stable_mosaic.version = 11 : i64} {
  func.func @ffn_kernel(%arg0: i32, %arg1: memref<16x384xf32, #tpu.memory_space<vmem>>, %arg2: memref<384x1536xbf16, #tpu.memory_space<vmem>>, %arg3: memref<1x1536xf32, #tpu.memory_space<vmem>>, %arg4: memref<1536x384xbf16, #tpu.memory_space<vmem>>, %arg5: memref<1x384xf32, #tpu.memory_space<vmem>>, %arg6: memref<16x384xf32, #tpu.memory_space<vmem>>) attributes {dimension_semantics = [#tpu.dimension_semantics<parallel>], iteration_bounds = array<i64: 1>, scalar_prefetch = 0 : i64, scratch_operands = 0 : i64, tpu.core_type = #tpu.core_type<tc>, window_params = [{transform_indices = @transform_0, window_bounds = array<i64: 16, 384>}, {pipeline_mode = #tpu.pipeline_mode<synchronous>, transform_indices = @transform_1, window_bounds = array<i64: 384, 1536>}, {pipeline_mode = #tpu.pipeline_mode<synchronous>, transform_indices = @transform_2, window_bounds = array<i64: 1, 1536>}, {pipeline_mode = #tpu.pipeline_mode<synchronous>, transform_indices = @transform_3, window_bounds = array<i64: 1536, 384>}, {pipeline_mode = #tpu.pipeline_mode<synchronous>, transform_indices = @transform_4, window_bounds = array<i64: 1, 384>}, {transform_indices = @transform_5, window_bounds = array<i64: 16, 384>}]} {
    %c0 = arith.constant 0 : index
    %c0_0 = arith.constant 0 : index
    %0 = vector.load %arg1[%c0, %c0_0] : memref<16x384xf32, #tpu.memory_space<vmem>>, vector<16x384xf32>
    %1 = arith.truncf %0 : vector<16x384xf32> to vector<16x384xbf16>
    %c0_1 = arith.constant 0 : index
    %c0_2 = arith.constant 0 : index
    %2 = vector.load %arg2[%c0_1, %c0_2] : memref<384x1536xbf16, #tpu.memory_space<vmem>>, vector<384x1536xbf16>
    %cst = arith.constant dense<0.000000e+00> : vector<16x1536xf32>
    %3 = tpu.matmul %1, %2, %cst {dimension_numbers = #tpu.dot_dimension_numbers<[1], [0], [0], [1], [0, 0, 1, 1], [], []>} : vector<16x384xbf16>, vector<384x1536xbf16>, vector<16x1536xf32> -> vector<16x1536xf32>
    %c0_3 = arith.constant 0 : index
    %c0_4 = arith.constant 0 : index
    %4 = vector.load %arg3[%c0_3, %c0_4] : memref<1x1536xf32, #tpu.memory_space<vmem>>, vector<1x1536xf32>
    %5 = vector.broadcast %4 : vector<1x1536xf32> to vector<16x1536xf32>
    %6 = arith.addf %3, %5 : vector<16x1536xf32>
    %cst_5 = arith.constant 0.000000e+00 : f32
    %7 = vector.broadcast %cst_5 : f32 to vector<16x1536xf32>
    %8 = arith.maximumf %6, %7 : vector<16x1536xf32>
    %9 = arith.truncf %8 : vector<16x1536xf32> to vector<16x1536xbf16>
    %c0_6 = arith.constant 0 : index
    %c0_7 = arith.constant 0 : index
    %10 = vector.load %arg4[%c0_6, %c0_7] : memref<1536x384xbf16, #tpu.memory_space<vmem>>, vector<1536x384xbf16>
    %cst_8 = arith.constant dense<0.000000e+00> : vector<16x384xf32>
    %11 = tpu.matmul %9, %10, %cst_8 {dimension_numbers = #tpu.dot_dimension_numbers<[1], [0], [0], [1], [0, 0, 1, 1], [], []>} : vector<16x1536xbf16>, vector<1536x384xbf16>, vector<16x384xf32> -> vector<16x384xf32>
    %c0_9 = arith.constant 0 : index
    %c0_10 = arith.constant 0 : index
    %12 = vector.load %arg5[%c0_9, %c0_10] : memref<1x384xf32, #tpu.memory_space<vmem>>, vector<1x384xf32>
    %13 = vector.broadcast %12 : vector<1x384xf32> to vector<16x384xf32>
    %14 = arith.addf %11, %13 : vector<16x384xf32>
    %c0_11 = arith.constant 0 : index
    %c0_12 = arith.constant 0 : index
    %15 = vector.load %arg6[%c0_11, %c0_12] : memref<16x384xf32, #tpu.memory_space<vmem>>, vector<16x384xf32>
    tpu.vector_store %arg6[%c0_11, %c0_12], %14 {strides = array<i32>} : memref<16x384xf32, #tpu.memory_space<vmem>>, vector<16x384xf32>,
    return
  }
  func.func @transform_0(%arg0: i32) -> (i32, i32) {
    %c0_i32 = arith.constant 0 : i32
    %c0_i32_0 = arith.constant 0 : i32
    return %arg0, %c0_i32 : i32, i32
  }
  func.func @transform_1(%arg0: i32) -> (i32, i32) {
    %c0_i32 = arith.constant 0 : i32
    %c0_i32_0 = arith.constant 0 : i32
    %c0_i32_1 = arith.constant 0 : i32
    return %c0_i32, %c0_i32_0 : i32, i32
  }
  func.func @transform_2(%arg0: i32) -> (i32, i32) {
    %c0_i32 = arith.constant 0 : i32
    %c0_i32_0 = arith.constant 0 : i32
    %c0_i32_1 = arith.constant 0 : i32
    return %c0_i32, %c0_i32_0 : i32, i32
  }
  func.func @transform_3(%arg0: i32) -> (i32, i32) {
    %c0_i32 = arith.constant 0 : i32
    %c0_i32_0 = arith.constant 0 : i32
    %c0_i32_1 = arith.constant 0 : i32
    return %c0_i32, %c0_i32_0 : i32, i32
  }
  func.func @transform_4(%arg0: i32) -> (i32, i32) {
    %c0_i32 = arith.constant 0 : i32
    %c0_i32_0 = arith.constant 0 : i32
    %c0_i32_1 = arith.constant 0 : i32
    return %c0_i32, %c0_i32_0 : i32, i32
  }
  func.func @transform_5(%arg0: i32) -> (i32, i32) {
    %c0_i32 = arith.constant 0 : i32
    %c0_i32_0 = arith.constant 0 : i32
    return %arg0, %c0_i32 : i32, i32
  }
}

</mosaic_0001>

<bundles_post_ra>
// kernel: feed_forward.1
= control target key start
LH: loop header
LB: loop body
LE: loop exit
PB: predicated region body
PF: predicated region fallthrough
CT: control target
= control target key end

     0   :  { %10 = vsyncpa [#allocation3], 0  ;;  %s6799_s0 = inlined_call_operand.hbm [shape: f32[16,384], index: 0, kind: input, shape index: {}]   ;;  %s6800_s1 = inlined_call_operand.hbm [shape: bf16[384,1536], index: 1, kind: input, shape index: {}]   ;;  %s6801_s2 = inlined_call_operand.vmem [shape: f32[1,1536], index: 2, kind: input, shape index: {}]   ;;  %s6802_s3 = inlined_call_operand.hbm [shape: bf16[1536,384], index: 3, kind: input, shape index: {}]   ;;  %s6803_s4 = inlined_call_operand.vmem [shape: f32[1,384], index: 4, kind: input, shape index: {}]   ;;  %s6804_s5 = inlined_call_operand.hbm [shape: f32[16,384], index: 5, kind: output, shape index: {}]  }
   0x1   :  { %11 = vsyncpa [#allocation6], 0 }
   0x2   :  { %12 = vsyncpa [#allocation4], 0  ;;  %s6583_s18 = smov [#allocation5]   ;;  %s6489_s22 = scalar_lea.hbm %s6800_s1, 36864 }
   0x3   :  { %s30_s19 = sshll.u32 %s6583_s18, 4  ;;  %p6490_p0 = scmp.ne.s32.totalorder %s6800_s1, %s6489_s22  ;;  %s31_s19 = int_to_ptr.vmem [resolvable:$true] %s30_s19 }
   0x4   :  { %p6493_p1 = scmp.lt.u32.totalorder %s6489_s22, %s6800_s1 }
   0x6   :  { %p6495_p2 = pnand %p6493_p1, %p6490_p0 }
   0x8   :  { %6498 = shalt.err (!%p6495_p2)
}
   0x9   :  { %s6499_s27 = scalar_lea.vmem %s31_s19, 36864  ;;  %p6504_p4 = scmp.lt.s32.totalorder %s31_s19, %s31_s19 }
   0xa   :  { %p6500_p3 = scmp.ne.s32.totalorder %s31_s19, %s6499_s27  ;;  %p6505_p5 = scmp.lt.s32.totalorder %s6499_s27, %s6499_s27 }
   0xc   :  { %p6506_p6 = por %p6505_p5, %p6504_p4 }
   0xe   :  { %p6507_p7 = pnand %p6506_p6, %p6500_p3 }
  0x10   :  { %6510 = shalt.err (!%p6507_p7)
}
  0x11   :  { %s6584_s28 = smov 768   ;;  %s6585_s29 = smov 48  }
  0x12   :  { %36 = dma.hbm_to_vmem [thread:$0]  %s6800_s1, 36864, %s31_s19, [#allocation6], %s6584_s28, %s6584_s28, %s6585_s29  }
  0x13   :  { %s6586_s7 = smov [#allocation2]   ;;  %s6511_s11 = scalar_lea.hbm %s6799_s0, 768 }
  0x14   :  { %s18_s8 = sshll.u32 %s6586_s7, 4  ;;  %p6512_p8 = scmp.ne.s32.totalorder %s6799_s0, %s6511_s11  ;;  %s19_s8 = int_to_ptr.vmem [resolvable:$true] %s18_s8 }
  0x15   :  { %p6515_p9 = scmp.lt.u32.totalorder %s6511_s11, %s6799_s0 }
  0x17   :  { %p6517_p10 = pnand %p6515_p9, %p6512_p8 }
  0x19   :  { %6520 = shalt.err (!%p6517_p10)
}
  0x1a   :  { %s6521_s16 = scalar_lea.vmem %s19_s8, 768  ;;  %p6526_p12 = scmp.lt.s32.totalorder %s19_s8, %s19_s8 }
  0x1b   :  { %p6522_p11 = scmp.ne.s32.totalorder %s19_s8, %s6521_s16  ;;  %p6527_p13 = scmp.lt.s32.totalorder %s6521_s16, %s6521_s16 }
  0x1d   :  { %p6528_p0 = por %p6527_p13, %p6526_p12 }
  0x1f   :  { %p6529_p1 = pnand %p6528_p0, %p6522_p11 }
  0x21   :  { %6532 = shalt.err (!%p6529_p1)
}
  0x22   :  { %s6587_s1 = smov 384   ;;  %s6588_s17 = smov 24  }
  0x23   :  { %24 = dma.hbm_to_vmem [thread:$0]  %s6799_s0, 768, %s19_s8, [#allocation3], %s6587_s1, %s6587_s1, %s6588_s17  }
  0x24   :  { %s6589_s20 = smov [#allocation7]   ;;  %s6533_s24 = scalar_lea.hbm %s6802_s3, 36864 }
  0x25   :  { %s44_s21 = sshll.u32 %s6589_s20, 4  ;;  %p6534_p2 = scmp.ne.s32.totalorder %s6802_s3, %s6533_s24  ;;  %s45_s21 = int_to_ptr.vmem [resolvable:$true] %s44_s21 }
  0x26   :  { %p6537_p3 = scmp.lt.u32.totalorder %s6533_s24, %s6802_s3 }
  0x28   :  { %p6539_p4 = pnand %p6537_p3, %p6534_p2 }
  0x2a   :  { %6542 = shalt.err (!%p6539_p4)
}
  0x2b   :  { %s6543_s29 = scalar_lea.vmem %s45_s21, 36864  ;;  %p6548_p6 = scmp.lt.s32.totalorder %s45_s21, %s45_s21 }
  0x2c   :  { %p6544_p5 = scmp.ne.s32.totalorder %s45_s21, %s6543_s29  ;;  %p6549_p7 = scmp.lt.s32.totalorder %s6543_s29, %s6543_s29 }
  0x2e   :  { %p6550_p8 = por %p6549_p7, %p6548_p6 }
  0x30   :  { %p6551_p9 = pnand %p6550_p8, %p6544_p5 }
  0x32   :  { %6554 = shalt.err (!%p6551_p9)
}
  0x33   :  { %s6590_s0 = smov 192   ;;  %s6591_s30 = smov 12  }
  0x34   :  { %50 = dma.hbm_to_vmem [thread:$0]  %s6802_s3, 36864, %s45_s21, [#allocation6], %s6590_s0, %s6590_s0, %s6591_s30  }
  0x35   :  { %6577 = dma.done.wait [#allocation3], 768  }
  0x36   :  { %6578 = vsyncadd [#allocation3], 4294966528 }
  0x37   :  { %6579 = dma.done.wait [#allocation6], 73728  }
  0x38   :  { %6580 = vsyncadd [#allocation6], 4294893568  ;;  %v5672_v0 = vld [vmem:[#allocation5 + $0x4] ss:$48 sps:$4 sm:$0xff]   ;;  %v5674_v1 = vld [vmem:[#allocation5] ss:$48 sps:$4 sm:$0xff]  }
  0x39   :  { %1864 = vmatprep.subr.bf16.mxu1 %v5672_v0  ;;  %v5675_v2 = vld [vmem:[#allocation5 + $0x64] ss:$48 sps:$4 sm:$0xff]   ;;  %v5677_v3 = vld [vmem:[#allocation5 + $0x60] ss:$48 sps:$4 sm:$0xff]   ;;  %v64_v18 = vld [vmem:[#allocation2 + $0x8] sm:$0xff] }
  0x3a   :  { %1865 = vmatpush1.bf16.msra.mxu1 %v5674_v1  ;;  %v5678_v4 = vld [vmem:[#allocation5 + $0xc4] ss:$48 sps:$4 sm:$0xff]   ;;  %v5680_v5 = vld [vmem:[#allocation5 + $0xc0] ss:$48 sps:$4 sm:$0xff]   ;;  %v66_v58 = vld [vmem:[#allocation2 + $0x18] sm:$0xff] }
  0x3b   :  { %1866 = vmatprep.subr.bf16.mxu1 %v5675_v2  ;;  %v5681_v6 = vld [vmem:[#allocation5 + $0x124] ss:$48 sps:$4 sm:$0xff]   ;;  %v5683_v7 = vld [vmem:[#allocation5 + $0x120] ss:$48 sps:$4 sm:$0xff]  }
  0x3c   :  { %v5684_v8 = vld [vmem:[#allocation5 + $0x184] ss:$48 sps:$4 sm:$0xff]   ;;  %v5686_v9 = vld [vmem:[#allocation5 + $0x180] ss:$48 sps:$4 sm:$0xff]  }
  0x3d   :  { %v5687_v10 = vld [vmem:[#allocation5 + $0x1e4] ss:$48 sps:$4 sm:$0xff]   ;;  %v5689_v11 = vld [vmem:[#allocation5 + $0x1e0] ss:$48 sps:$4 sm:$0xff]  }
  0x3e   :  { %1867 = vmatpush1.bf16.msra.mxu1 %v5677_v3  ;;  %v5690_v12 = vld [vmem:[#allocation5 + $0x244] ss:$48 sps:$4 sm:$0xff]   ;;  %v5692_v14 = vld [vmem:[#allocation5 + $0x240] ss:$48 sps:$4 sm:$0xff]   ;;  %v6592_v3 = vmov 0  }
  0x3f   :  { %1868 = vmatprep.subr.bf16.mxu1 %v5678_v4  ;;  %v5717_v13 = vld [vmem:[#allocation5 + $0x14] ss:$48 sps:$4 sm:$0xff]   ;;  %v5721_v16 = vld [vmem:[#allocation5 + $0x10] ss:$48 sps:$4 sm:$0xff]  }
  0x40   :  { %v5693_v15 = vld [vmem:[#allocation5 + $0x2a4] ss:$48 sps:$4 sm:$0xff]   ;;  %2036 = vmatprep.subr.bf16.mxu0 %v5717_v13  ;;  %v5728_v21 = vld [vmem:[#allocation5 + $0x70] ss:$48 sps:$4 sm:$0xff]  }
  0x41   :  { %v5723_v17 = vld [vmem:[#allocation5 + $0x74] ss:$48 sps:$4 sm:$0xff]   ;;  %2037 = vmatpush1.bf16.msra.mxu0 %v5721_v16  ;;  %v5695_v22 = vld [vmem:[#allocation5 + $0x2a0] ss:$48 sps:$4 sm:$0xff]  }
  0x42   :  { %1869 = vmatpush1.bf16.msra.mxu1 %v5680_v5  ;;  %v67_v19 = vld [vmem:[#allocation2 + $0x20] sm:$0xff]  ;;  %2038 = vmatprep.subr.bf16.mxu0 %v5723_v17 }
  0x43   :  { %1870 = vmatprep.subr.bf16.mxu1 %v5681_v6  ;;  %v6663_v20 = vpack.c.bf16 %v67_v19, %v64_v18  ;;  %v5729_v23 = vld [vmem:[#allocation5 + $0xd4] ss:$48 sps:$4 sm:$0xff]   ;;  %v5734_v25 = vld [vmem:[#allocation5 + $0xd0] ss:$48 sps:$4 sm:$0xff]  }
  0x44   :  { %v5696_v24 = vld [vmem:[#allocation5 + $0x304] ss:$48 sps:$4 sm:$0xff]   ;;  %v5698_v27 = vld [vmem:[#allocation5 + $0x300] ss:$48 sps:$4 sm:$0xff]  }
  0x45   :  { %1896 = vmatprep.mubr.bf16.mxu1 %v6663_v20  ;;  %2039 = vmatpush1.bf16.msra.mxu0 %v5728_v21  ;;  %v5735_v26 = vld [vmem:[#allocation5 + $0x134] ss:$48 sps:$4 sm:$0xff]   ;;  %v5740_v29 = vld [vmem:[#allocation5 + $0x130] ss:$48 sps:$4 sm:$0xff]  }
  0x46   :  { %1871 = vmatpush1.bf16.msra.mxu1 %v5683_v7  ;;  %2040 = vmatprep.subr.bf16.mxu0 %v5729_v23  ;;  %v5699_v28 = vld [vmem:[#allocation5 + $0x364] ss:$48 sps:$4 sm:$0xff]   ;;  %v5701_v31 = vld [vmem:[#allocation5 + $0x360] ss:$48 sps:$4 sm:$0xff]  }
  0x47   :  { %1872 = vmatprep.subr.bf16.mxu1 %v5684_v8  ;;  %2068 = vmatprep.mubr.bf16.mxu0 %v6663_v20  ;;  %v5741_v30 = vld [vmem:[#allocation5 + $0x194] ss:$48 sps:$4 sm:$0xff]   ;;  %v5746_v33 = vld [vmem:[#allocation5 + $0x190] ss:$48 sps:$4 sm:$0xff]  }
  0x48   :  { %v5702_v32 = vld [vmem:[#allocation5 + $0x3c4] ss:$48 sps:$4 sm:$0xff]   ;;  %v5704_v35 = vld [vmem:[#allocation5 + $0x3c0] ss:$48 sps:$4 sm:$0xff]  }
  0x49   :  { %2041 = vmatpush1.bf16.msra.mxu0 %v5734_v25  ;;  %v5747_v34 = vld [vmem:[#allocation5 + $0x1f4] ss:$48 sps:$4 sm:$0xff]   ;;  %v5752_v37 = vld [vmem:[#allocation5 + $0x1f0] ss:$48 sps:$4 sm:$0xff]  }
  0x4a   :  { %1873 = vmatpush1.bf16.msra.mxu1 %v5686_v9  ;;  %2042 = vmatprep.subr.bf16.mxu0 %v5735_v26  ;;  %v5705_v36 = vld [vmem:[#allocation5 + $0x424] ss:$48 sps:$4 sm:$0xff]   ;;  %v5707_v39 = vld [vmem:[#allocation5 + $0x420] ss:$48 sps:$4 sm:$0xff]  }
  0x4b   :  { %1874 = vmatprep.subr.bf16.mxu1 %v5687_v10  ;;  %v5753_v38 = vld [vmem:[#allocation5 + $0x254] ss:$48 sps:$4 sm:$0xff]   ;;  %v5758_v41 = vld [vmem:[#allocation5 + $0x250] ss:$48 sps:$4 sm:$0xff]  }
  0x4c   :  { %v5708_v40 = vld [vmem:[#allocation5 + $0x484] ss:$48 sps:$4 sm:$0xff]   ;;  %v5710_v43 = vld [vmem:[#allocation5 + $0x480] ss:$48 sps:$4 sm:$0xff]  }
  0x4d   :  { %2043 = vmatpush1.bf16.msra.mxu0 %v5740_v29  ;;  %v5759_v42 = vld [vmem:[#allocation5 + $0x2b4] ss:$48 sps:$4 sm:$0xff]   ;;  %v5764_v45 = vld [vmem:[#allocation5 + $0x2b0] ss:$48 sps:$4 sm:$0xff]  }
  0x4e   :  { %1875 = vmatpush1.bf16.msra.mxu1 %v5689_v11  ;;  %2044 = vmatprep.subr.bf16.mxu0 %v5741_v30  ;;  %v5711_v44 = vld [vmem:[#allocation5 + $0x4e4] ss:$48 sps:$4 sm:$0xff]   ;;  %v5713_v47 = vld [vmem:[#allocation5 + $0x4e0] ss:$48 sps:$4 sm:$0xff]   ;;  %v68_v30 = vld [vmem:[#allocation2 + $0x28] sm:$0xff] }
  0x4f   :  { %1876 = vmatprep.subr.bf16.mxu1 %v5690_v12  ;;  %v5765_v46 = vld [vmem:[#allocation5 + $0x314] ss:$48 sps:$4 sm:$0xff]   ;;  %v5770_v49 = vld [vmem:[#allocation5 + $0x310] ss:$48 sps:$4 sm:$0xff]  }
  0x50   :  { %v5714_v48 = vld [vmem:[#allocation5 + $0x544] ss:$48 sps:$4 sm:$0xff]   ;;  %v5716_v51 = vld [vmem:[#allocation5 + $0x540] ss:$48 sps:$4 sm:$0xff]  }
  0x51   :  { %2045 = vmatpush1.bf16.msra.mxu0 %v5746_v33  ;;  %v5771_v50 = vld [vmem:[#allocation5 + $0x374] ss:$48 sps:$4 sm:$0xff]   ;;  %v5776_v53 = vld [vmem:[#allocation5 + $0x370] ss:$48 sps:$4 sm:$0xff]  }
  0x52   :  { %1877 = vmatpush1.bf16.msra.mxu1 %v5692_v14  ;;  %2046 = vmatprep.subr.bf16.mxu0 %v5747_v34  ;;  %v5719_v52 = vld [vmem:[#allocation5 + $0x5a4] ss:$48 sps:$4 sm:$0xff]   ;;  %v5722_v54 = vld [vmem:[#allocation5 + $0x5a0] ss:$48 sps:$4 sm:$0xff]  }
  0x53   :  { %1878 = vmatprep.subr.bf16.mxu1 %v5693_v15  ;;  %v5777_v55 = vld [vmem:[#allocation5 + $0x3d4] ss:$48 sps:$4 sm:$0xff]   ;;  %v5782_v59 = vld [vmem:[#allocation5 + $0x3d0] ss:$48 sps:$4 sm:$0xff]  }
  0x54   :  { %v5727_v56 = vld [vmem:[#allocation5 + $0x604] ss:$48 sps:$4 sm:$0xff]   ;;  %v5725_v62 = vld [vmem:[#allocation5 + $0x600] ss:$48 sps:$4 sm:$0xff]  }
  0x55   :  { %2047 = vmatpush1.bf16.msra.mxu0 %v5752_v37  ;;  %v63_v57 = vld [vmem:[#allocation2] sm:$0xff]  ;;  %v65_v29 = vld [vmem:[#allocation2 + $0x10] sm:$0xff] }
  0x56   :  { %1879 = vmatpush1.bf16.msra.mxu1 %v5695_v22  ;;  %2048 = vmatprep.subr.bf16.mxu0 %v5753_v38  ;;  %v5783_v60 = vld [vmem:[#allocation5 + $0x434] ss:$48 sps:$4 sm:$0xff]   ;;  %v6667_v61 = vpack.c.bf16 %v66_v58, %v63_v57  ;;  %v5788_v0 = vld [vmem:[#allocation5 + $0x430] ss:$48 sps:$4 sm:$0xff]   ;;  %v6673_v34 = vpack.c.bf16 %v68_v30, %v65_v29  ;;  %v5858_v30 = vld [vmem:[#allocation5 + $0x548] ss:$48 sps:$4 sm:$0xff]  }
  0x57   :  { %1880 = vmatprep.subr.bf16.mxu1 %v5696_v24  ;;  %v5733_v63 = vld [vmem:[#allocation5 + $0x664] ss:$48 sps:$4 sm:$0xff]   ;;  %v5731_v2 = vld [vmem:[#allocation5 + $0x660] ss:$48 sps:$4 sm:$0xff]  }
  0x58   :  { %v5789_v1 = vld [vmem:[#allocation5 + $0x494] ss:$48 sps:$4 sm:$0xff]   ;;  %v5794_v5 = vld [vmem:[#allocation5 + $0x490] ss:$48 sps:$4 sm:$0xff]  }
  0x59   :  { %2049 = vmatpush1.bf16.msra.mxu0 %v5758_v41  ;;  %v5739_v4 = vld [vmem:[#allocation5 + $0x6c4] ss:$48 sps:$4 sm:$0xff]   ;;  %v5737_v7 = vld [vmem:[#allocation5 + $0x6c0] ss:$48 sps:$4 sm:$0xff]  }
  0x5a   :  { %1881 = vmatpush1.bf16.msra.mxu1 %v5698_v27  ;;  %2050 = vmatprep.subr.bf16.mxu0 %v5759_v42  ;;  %v5795_v6 = vld [vmem:[#allocation5 + $0x4f4] ss:$48 sps:$4 sm:$0xff]   ;;  %v5800_v9 = vld [vmem:[#allocation5 + $0x4f0] ss:$48 sps:$4 sm:$0xff]  }
  0x5b   :  { %1882 = vmatprep.subr.bf16.mxu1 %v5699_v28  ;;  %v5745_v8 = vld [vmem:[#allocation5 + $0x724] ss:$48 sps:$4 sm:$0xff]   ;;  %v5743_v11 = vld [vmem:[#allocation5 + $0x720] ss:$48 sps:$4 sm:$0xff]  }
  0x5c   :  { %v5801_v10 = vld [vmem:[#allocation5 + $0x554] ss:$48 sps:$4 sm:$0xff]   ;;  %v5806_v13 = vld [vmem:[#allocation5 + $0x550] ss:$48 sps:$4 sm:$0xff]  }
  0x5d   :  { %2051 = vmatpush1.bf16.msra.mxu0 %v5764_v45  ;;  %v5751_v12 = vld [vmem:[#allocation5 + $0x784] ss:$48 sps:$4 sm:$0xff]   ;;  %v5749_v15 = vld [vmem:[#allocation5 + $0x780] ss:$48 sps:$4 sm:$0xff]  }
  0x5e   :  { %1883 = vmatpush1.bf16.msra.mxu1 %v5701_v31  ;;  %2052 = vmatprep.subr.bf16.mxu0 %v5765_v46  ;;  %v5807_v14 = vld [vmem:[#allocation5 + $0x5b4] ss:$48 sps:$4 sm:$0xff]   ;;  %v5812_v17 = vld [vmem:[#allocation5 + $0x5b0] ss:$48 sps:$4 sm:$0xff]   ;;  %v5775_v31 = vld [vmem:[#allocation5 + $0xc] ss:$48 sps:$4 sm:$0xff]  }
  0x5f   :  { %1884 = vmatprep.subr.bf16.mxu1 %v5702_v32  ;;  %v5757_v16 = vld [vmem:[#allocation5 + $0x7e4] ss:$48 sps:$4 sm:$0xff]   ;;  %v5755_v19 = vld [vmem:[#allocation5 + $0x7e0] ss:$48 sps:$4 sm:$0xff]  }
  0x60   :  { %v5815_v18 = vld [vmem:[#allocation5 + $0x614] ss:$48 sps:$4 sm:$0xff]   ;;  %v5813_v22 = vld [vmem:[#allocation5 + $0x610] ss:$48 sps:$4 sm:$0xff]  }
  0x61   :  { %2053 = vmatpush1.bf16.msra.mxu0 %v5770_v49  ;;  %v5763_v21 = vld [vmem:[#allocation5 + $0x844] ss:$48 sps:$4 sm:$0xff]   ;;  %v5761_v24 = vld [vmem:[#allocation5 + $0x840] ss:$48 sps:$4 sm:$0xff]  }
  0x62   :  { %1885 = vmatpush1.bf16.msra.mxu1 %v5704_v35  ;;  %2054 = vmatprep.subr.bf16.mxu0 %v5771_v50  ;;  %v5821_v23 = vld [vmem:[#allocation5 + $0x674] ss:$48 sps:$4 sm:$0xff]   ;;  %v5819_v26 = vld [vmem:[#allocation5 + $0x670] ss:$48 sps:$4 sm:$0xff]   ;;  %v5773_v35 = vld [vmem:[#allocation5 + $0x8] ss:$48 sps:$4 sm:$0xff]  }
  0x63   :  { %1886 = vmatprep.subr.bf16.mxu1 %v5705_v36  ;;  %v5769_v25 = vld [vmem:[#allocation5 + $0x8a4] ss:$48 sps:$4 sm:$0xff]   ;;  %v5767_v27 = vld [vmem:[#allocation5 + $0x8a0] ss:$48 sps:$4 sm:$0xff]   ;;  %v5781_v36 = vld [vmem:[#allocation5 + $0x6c] ss:$48 sps:$4 sm:$0xff]  }
  0x64   :  { %v5827_v28 = vld [vmem:[#allocation5 + $0x6d4] ss:$48 sps:$4 sm:$0xff]   ;;  %v5825_v32 = vld [vmem:[#allocation5 + $0x6d0] ss:$48 sps:$4 sm:$0xff]  }
  0x65   :  { %2055 = vmatpush1.bf16.msra.mxu0 %v5776_v53  ;;  %v5833_v33 = vld [vmem:[#allocation5 + $0x734] ss:$48 sps:$4 sm:$0xff]   ;;  %v5831_v37 = vld [vmem:[#allocation5 + $0x730] ss:$48 sps:$4 sm:$0xff]  }
  0x66   :  { %1887 = vmatpush1.bf16.msra.mxu1 %v5707_v39  ;;  %2056 = vmatprep.subr.bf16.mxu0 %v5777_v55  ;;  %v5839_v38 = vld [vmem:[#allocation5 + $0x794] ss:$48 sps:$4 sm:$0xff]   ;;  %v5779_v39 = vld [vmem:[#allocation5 + $0x68] ss:$48 sps:$4 sm:$0xff]   ;;  %v5837_v41 = vld [vmem:[#allocation5 + $0x790] ss:$48 sps:$4 sm:$0xff]  }
  0x67   :  { %1888 = vmatprep.subr.bf16.mxu1 %v5708_v40  ;;  %v5787_v40 = vld [vmem:[#allocation5 + $0xcc] ss:$48 sps:$4 sm:$0xff]   ;;  %v5845_v42 = vld [vmem:[#allocation5 + $0x7f4] ss:$48 sps:$4 sm:$0xff]   ;;  %v5843_v45 = vld [vmem:[#allocation5 + $0x7f0] ss:$48 sps:$4 sm:$0xff]  }
  0x68   :  { %v5851_v46 = vld [vmem:[#allocation5 + $0x854] ss:$48 sps:$4 sm:$0xff]   ;;  %v5849_v49 = vld [vmem:[#allocation5 + $0x850] ss:$48 sps:$4 sm:$0xff]   ;;  %v5803_v55 = vld [vmem:[#allocation5 + $0x1e8] ss:$48 sps:$4 sm:$0xff]  }
  0x69   :  { %2057 = vmatpush1.bf16.msra.mxu0 %v5782_v59  ;;  %v5857_v50 = vld [vmem:[#allocation5 + $0x8b4] ss:$48 sps:$4 sm:$0xff]   ;;  %v5855_v53 = vld [vmem:[#allocation5 + $0x8b0] ss:$48 sps:$4 sm:$0xff]   ;;  %v5809_v59 = vld [vmem:[#allocation5 + $0x248] ss:$48 sps:$4 sm:$0xff]  }
  0x6a   :  { %1889 = vmatpush1.bf16.msra.mxu1 %v5710_v43  ;;  %2058 = vmatprep.subr.bf16.mxu0 %v5783_v60  ;;  %v5785_v43 = vld [vmem:[#allocation5 + $0xc8] ss:$48 sps:$4 sm:$0xff]   ;;  %v5861_v57 = vld [vmem:[#allocation5 + $0x20] ss:$48 sps:$4 sm:$0xff]   ;;  %v5869_v58 = vld [vmem:[#allocation5 + $0x84] ss:$48 sps:$4 sm:$0xff]  }
  0x6b   :  { %1890 = vmatprep.subr.bf16.mxu1 %v5711_v44  ;;  %v5793_v44 = vld [vmem:[#allocation5 + $0x12c] ss:$48 sps:$4 sm:$0xff]   ;;  %v5917_v29 = vld [vmem:[#allocation5 + $0x384] ss:$48 sps:$4 sm:$0xff]  }
  0x6c   :  { %v5818_v60 = vld [vmem:[#allocation5 + $0x2ac] ss:$48 sps:$4 sm:$0xff]  }
  0x6d   :  { %2059 = vmatpush1.bf16.msra.mxu0 %v5788_v0  ;;  %v5816_v0 = vld [vmem:[#allocation5 + $0x2a8] ss:$48 sps:$4 sm:$0xff]  }
  0x6e   :  { %1891 = vmatpush1.bf16.msra.mxu1 %v5713_v47  ;;  %2060 = vmatprep.subr.bf16.mxu0 %v5789_v1  ;;  %v5791_v47 = vld [vmem:[#allocation5 + $0x128] ss:$48 sps:$4 sm:$0xff]   ;;  %v5824_v1 = vld [vmem:[#allocation5 + $0x30c] ss:$48 sps:$4 sm:$0xff]  }
  0x6f   :  { %1892 = vmatprep.subr.bf16.mxu1 %v5714_v48  ;;  %v5799_v48 = vld [vmem:[#allocation5 + $0x18c] ss:$48 sps:$4 sm:$0xff]  }
  0x71   :  { %2061 = vmatpush1.bf16.msra.mxu0 %v5794_v5  ;;  %v5822_v5 = vld [vmem:[#allocation5 + $0x308] ss:$48 sps:$4 sm:$0xff]  }
  0x72   :  { %1893 = vmatpush1.bf16.msra.mxu1 %v5716_v51  ;;  %2062 = vmatprep.subr.bf16.mxu0 %v5795_v6  ;;  %v5797_v51 = vld [vmem:[#allocation5 + $0x188] ss:$48 sps:$4 sm:$0xff]   ;;  %v5830_v6 = vld [vmem:[#allocation5 + $0x36c] ss:$48 sps:$4 sm:$0xff]  }
  0x73   :  { %1894 = vmatprep.subr.bf16.mxu1 %v5719_v52  ;;  %v5805_v52 = vld [vmem:[#allocation5 + $0x1ec] ss:$48 sps:$4 sm:$0xff]  }
  0x75   :  { %2063 = vmatpush1.bf16.msra.mxu0 %v5800_v9  ;;  %v5828_v9 = vld [vmem:[#allocation5 + $0x368] ss:$48 sps:$4 sm:$0xff]  }
  0x76   :  { %1895 = vmatpush1.bf16.msra.mxu1 %v5722_v54  ;;  %2064 = vmatprep.subr.bf16.mxu0 %v5801_v10  ;;  %v5863_v54 = vld [vmem:[#allocation5 + $0x24] ss:$48 sps:$4 sm:$0xff]   ;;  %v5836_v10 = vld [vmem:[#allocation5 + $0x3cc] ss:$48 sps:$4 sm:$0xff]  }
  0x77   :  { %1907 = vmatprep.subr.bf16.mxu1 %v5727_v56  ;;  %v5811_v56 = vld [vmem:[#allocation5 + $0x24c] ss:$48 sps:$4 sm:$0xff]  }
  0x79   :  { %1897 = vmatmul.mubr.bf16.vlgmr.msra.gmra.mrb[0].mxu1 %v6667_v61  ;;  %2065 = vmatpush1.bf16.msra.mxu0 %v5806_v13  ;;  %v5834_v13 = vld [vmem:[#allocation5 + $0x3c8] ss:$48 sps:$4 sm:$0xff]  }
  0x7a   :  { %1908 = vmatpush1.bf16.msra.mxu1 %v5725_v62  ;;  %1939 = vmatprep.mubr.bf16.mxu1 %v6592_v3  ;;  %v5867_v62 = vld [vmem:[#allocation5 + $0x80] ss:$48 sps:$4 sm:$0xff]  }
  0x7b   :  { %1909 = vmatprep.subr.bf16.mxu1 %v5733_v63  ;;  %2066 = vmatprep.subr.bf16.mxu0 %v5807_v14  ;;  %v5875_v63 = vld [vmem:[#allocation5 + $0xe4] ss:$48 sps:$4 sm:$0xff]   ;;  %v5842_v14 = vld [vmem:[#allocation5 + $0x42c] ss:$48 sps:$4 sm:$0xff]  }
  0x7d   :  { %2067 = vmatpush1.bf16.msra.mxu0 %v5812_v17  ;;  %v5840_v17 = vld [vmem:[#allocation5 + $0x428] ss:$48 sps:$4 sm:$0xff]  }
  0x7e   :  { %1910 = vmatpush1.bf16.msra.mxu1 %v5731_v2  ;;  %2079 = vmatprep.subr.bf16.mxu0 %v5815_v18  ;;  %v5873_v2 = vld [vmem:[#allocation5 + $0xe0] ss:$48 sps:$4 sm:$0xff]   ;;  %v5848_v18 = vld [vmem:[#allocation5 + $0x48c] ss:$48 sps:$4 sm:$0xff]  }
  0x7f   :  { %1911 = vmatprep.subr.bf16.mxu1 %v5739_v4  ;;  %v5881_v4 = vld [vmem:[#allocation5 + $0x144] ss:$48 sps:$4 sm:$0xff]  }
  0x80   :  { %2069 = vmatmul.mubr.bf16.vlgmr.msra.gmra.mrb[0].mxu0 %v6667_v61 }
  0x81   :  { %2080 = vmatpush1.bf16.msra.mxu0 %v5813_v22  ;;  %2111 = vmatprep.mubr.bf16.mxu0 %v6592_v3  ;;  %v5846_v22 = vld [vmem:[#allocation5 + $0x488] ss:$48 sps:$4 sm:$0xff]  }
  0x82   :  { %1912 = vmatpush1.bf16.msra.mxu1 %v5737_v7  ;;  %2081 = vmatprep.subr.bf16.mxu0 %v5821_v23  ;;  %v5879_v7 = vld [vmem:[#allocation5 + $0x140] ss:$48 sps:$4 sm:$0xff]   ;;  %v5854_v23 = vld [vmem:[#allocation5 + $0x4ec] ss:$48 sps:$4 sm:$0xff]  }
  0x83   :  { %1913 = vmatprep.subr.bf16.mxu1 %v5745_v8  ;;  %v5887_v8 = vld [vmem:[#allocation5 + $0x1a4] ss:$48 sps:$4 sm:$0xff]  }
  0x85   :  { %2082 = vmatpush1.bf16.msra.mxu0 %v5819_v26  ;;  %v5852_v26 = vld [vmem:[#allocation5 + $0x4e8] ss:$48 sps:$4 sm:$0xff]  }
  0x86   :  { %1914 = vmatpush1.bf16.msra.mxu1 %v5743_v11  ;;  %2083 = vmatprep.subr.bf16.mxu0 %v5827_v28  ;;  %v5885_v11 = vld [vmem:[#allocation5 + $0x1a0] ss:$48 sps:$4 sm:$0xff]  }
  0x87   :  { %1915 = vmatprep.subr.bf16.mxu1 %v5751_v12  ;;  %v5893_v12 = vld [vmem:[#allocation5 + $0x204] ss:$48 sps:$4 sm:$0xff]   ;;  %v5909_v28 = vld [vmem:[#allocation5 + $0x320] ss:$48 sps:$4 sm:$0xff]  }
  0x89   :  { %2084 = vmatpush1.bf16.msra.mxu0 %v5825_v32  ;;  %v5915_v32 = vld [vmem:[#allocation5 + $0x380] ss:$48 sps:$4 sm:$0xff]  }
  0x8a   :  { %1916 = vmatpush1.bf16.msra.mxu1 %v5749_v15  ;;  %2085 = vmatprep.subr.bf16.mxu0 %v5833_v33  ;;  %v5891_v15 = vld [vmem:[#allocation5 + $0x200] ss:$48 sps:$4 sm:$0xff]   ;;  %v5923_v33 = vld [vmem:[#allocation5 + $0x3e4] ss:$48 sps:$4 sm:$0xff]  }
  0x8b   :  { %1917 = vmatprep.subr.bf16.mxu1 %v5757_v16  ;;  %v5899_v16 = vld [vmem:[#allocation5 + $0x264] ss:$48 sps:$4 sm:$0xff]  }
  0x8d   :  { %2086 = vmatpush1.bf16.msra.mxu0 %v5831_v37  ;;  %v5921_v37 = vld [vmem:[#allocation5 + $0x3e0] ss:$48 sps:$4 sm:$0xff]  }
  0x8e   :  { %1918 = vmatpush1.bf16.msra.mxu1 %v5755_v19  ;;  %2087 = vmatprep.subr.bf16.mxu0 %v5839_v38  ;;  %v5897_v19 = vld [vmem:[#allocation5 + $0x260] ss:$48 sps:$4 sm:$0xff]   ;;  %v5929_v38 = vld [vmem:[#allocation5 + $0x444] ss:$48 sps:$4 sm:$0xff]  }
  0x8f   :  { %1919 = vmatprep.subr.bf16.mxu1 %v5763_v21  ;;  %v5905_v21 = vld [vmem:[#allocation5 + $0x2c4] ss:$48 sps:$4 sm:$0xff]  }
  0x91   :  { %2088 = vmatpush1.bf16.msra.mxu0 %v5837_v41  ;;  %v5927_v41 = vld [vmem:[#allocation5 + $0x440] ss:$48 sps:$4 sm:$0xff]  }
  0x92   :  { %1920 = vmatpush1.bf16.msra.mxu1 %v5761_v24  ;;  %2089 = vmatprep.subr.bf16.mxu0 %v5845_v42  ;;  %v5903_v24 = vld [vmem:[#allocation5 + $0x2c0] ss:$48 sps:$4 sm:$0xff]   ;;  %v5935_v42 = vld [vmem:[#allocation5 + $0x4a4] ss:$48 sps:$4 sm:$0xff]  }
  0x93   :  { %1921 = vmatprep.subr.bf16.mxu1 %v5769_v25  ;;  %v5911_v25 = vld [vmem:[#allocation5 + $0x324] ss:$48 sps:$4 sm:$0xff]  }
  0x95   :  { %2090 = vmatpush1.bf16.msra.mxu0 %v5843_v45  ;;  %v5933_v45 = vld [vmem:[#allocation5 + $0x4a0] ss:$48 sps:$4 sm:$0xff]  }
  0x96   :  { %1922 = vmatpush1.bf16.msra.mxu1 %v5767_v27  ;;  %2091 = vmatprep.subr.bf16.mxu0 %v5851_v46  ;;  %v5860_v27 = vld [vmem:[#allocation5 + $0x54c] ss:$48 sps:$4 sm:$0xff]   ;;  %v5941_v46 = vld [vmem:[#allocation5 + $0x504] ss:$48 sps:$4 sm:$0xff]  }
  0x97   :  { %1950 = vmatprep.subr.bf16.mxu1 %v5775_v31  ;;  %v5866_v31 = vld [vmem:[#allocation5 + $0x5ac] ss:$48 sps:$4 sm:$0xff]  }
  0x99   :  { %1940 = vmatmul.mubr.bf16.vlgmr.msra.gmra.mrb[0].mxu1 %v6673_v34  ;;  %2092 = vmatpush1.bf16.msra.mxu0 %v5849_v49  ;;  %v5939_v49 = vld [vmem:[#allocation5 + $0x500] ss:$48 sps:$4 sm:$0xff]  }
  0x9a   :  { %1951 = vmatpush1.bf16.msra.mxu1 %v5773_v35  ;;  %1982 = vmatprep.mubr.bf16.mxu1 %v6663_v20  ;;  %v5864_v35 = vld [vmem:[#allocation5 + $0x5a8] ss:$48 sps:$4 sm:$0xff]  }
  0x9b   :  { %1952 = vmatprep.subr.bf16.mxu1 %v5781_v36  ;;  %2093 = vmatprep.subr.bf16.mxu0 %v5857_v50  ;;  %v5872_v36 = vld [vmem:[#allocation5 + $0x60c] ss:$48 sps:$4 sm:$0xff]   ;;  %v5947_v50 = vld [vmem:[#allocation5 + $0x564] ss:$48 sps:$4 sm:$0xff]  }
  0x9d   :  { %2094 = vmatpush1.bf16.msra.mxu0 %v5855_v53  ;;  %v5945_v53 = vld [vmem:[#allocation5 + $0x560] ss:$48 sps:$4 sm:$0xff]  }
  0x9e   :  { %1953 = vmatpush1.bf16.msra.mxu1 %v5779_v39  ;;  %2208 = vmatprep.subr.bf16.mxu0 %v5863_v54  ;;  %v5870_v39 = vld [vmem:[#allocation5 + $0x608] ss:$48 sps:$4 sm:$0xff]   ;;  %v5953_v54 = vld [vmem:[#allocation5 + $0x5c4] ss:$48 sps:$4 sm:$0xff]  }
  0x9f   :  { %1954 = vmatprep.subr.bf16.mxu1 %v5787_v40  ;;  %v5878_v40 = vld [vmem:[#allocation5 + $0x66c] ss:$48 sps:$4 sm:$0xff]  }
  0xa0   :  { %2112 = vmatmul.mubr.bf16.vlgmr.msra.gmra.mrb[0].mxu0 %v6673_v34 }
  0xa1   :  { %2209 = vmatpush1.bf16.msra.mxu0 %v5861_v57  ;;  %2240 = vmatprep.mubr.bf16.mxu0 %v6663_v20  ;;  %v5951_v57 = vld [vmem:[#allocation5 + $0x5c0] ss:$48 sps:$4 sm:$0xff]  }
  0xa2   :  { %1955 = vmatpush1.bf16.msra.mxu1 %v5785_v43  ;;  %2210 = vmatprep.subr.bf16.mxu0 %v5869_v58  ;;  %v5876_v43 = vld [vmem:[#allocation5 + $0x668] ss:$48 sps:$4 sm:$0xff]   ;;  %v5959_v58 = vld [vmem:[#allocation5 + $0x624] ss:$48 sps:$4 sm:$0xff]  }
  0xa3   :  { %1956 = vmatprep.subr.bf16.mxu1 %v5793_v44  ;;  %v5884_v44 = vld [vmem:[#allocation5 + $0x6cc] ss:$48 sps:$4 sm:$0xff]  }
  0xa5   :  { %2211 = vmatpush1.bf16.msra.mxu0 %v5867_v62  ;;  %v5957_v62 = vld [vmem:[#allocation5 + $0x620] ss:$48 sps:$4 sm:$0xff]  }
  0xa6   :  { %1957 = vmatpush1.bf16.msra.mxu1 %v5791_v47  ;;  %2212 = vmatprep.subr.bf16.mxu0 %v5875_v63  ;;  %v5882_v47 = vld [vmem:[#allocation5 + $0x6c8] ss:$48 sps:$4 sm:$0xff]   ;;  %v5965_v63 = vld [vmem:[#allocation5 + $0x684] ss:$48 sps:$4 sm:$0xff]  }
  0xa7   :  { %1958 = vmatprep.subr.bf16.mxu1 %v5799_v48  ;;  %v5890_v48 = vld [vmem:[#allocation5 + $0x72c] ss:$48 sps:$4 sm:$0xff]  }
  0xa9   :  { %2213 = vmatpush1.bf16.msra.mxu0 %v5873_v2  ;;  %v5963_v2 = vld [vmem:[#allocation5 + $0x680] ss:$48 sps:$4 sm:$0xff]  }
  0xaa   :  { %1959 = vmatpush1.bf16.msra.mxu1 %v5797_v51  ;;  %2214 = vmatprep.subr.bf16.mxu0 %v5881_v4  ;;  %v5888_v51 = vld [vmem:[#allocation5 + $0x728] ss:$48 sps:$4 sm:$0xff]   ;;  %v5971_v4 = vld [vmem:[#allocation5 + $0x6e4] ss:$48 sps:$4 sm:$0xff]  }
  0xab   :  { %1960 = vmatprep.subr.bf16.mxu1 %v5805_v52  ;;  %v5896_v52 = vld [vmem:[#allocation5 + $0x78c] ss:$48 sps:$4 sm:$0xff]  }
  0xad   :  { %2215 = vmatpush1.bf16.msra.mxu0 %v5879_v7  ;;  %v5969_v7 = vld [vmem:[#allocation5 + $0x6e0] ss:$48 sps:$4 sm:$0xff]  }
  0xae   :  { %1961 = vmatpush1.bf16.msra.mxu1 %v5803_v55  ;;  %2216 = vmatprep.subr.bf16.mxu0 %v5887_v8  ;;  %v5894_v55 = vld [vmem:[#allocation5 + $0x788] ss:$48 sps:$4 sm:$0xff]   ;;  %v5977_v8 = vld [vmem:[#allocation5 + $0x744] ss:$48 sps:$4 sm:$0xff]  }
  0xaf   :  { %1962 = vmatprep.subr.bf16.mxu1 %v5811_v56  ;;  %v5902_v56 = vld [vmem:[#allocation5 + $0x7ec] ss:$48 sps:$4 sm:$0xff]  }
  0xb1   :  { %2217 = vmatpush1.bf16.msra.mxu0 %v5885_v11  ;;  %v5975_v11 = vld [vmem:[#allocation5 + $0x740] ss:$48 sps:$4 sm:$0xff]  }
  0xb2   :  { %1963 = vmatpush1.bf16.msra.mxu1 %v5809_v59  ;;  %2218 = vmatprep.subr.bf16.mxu0 %v5893_v12  ;;  %v5900_v59 = vld [vmem:[#allocation5 + $0x7e8] ss:$48 sps:$4 sm:$0xff]   ;;  %v5983_v12 = vld [vmem:[#allocation5 + $0x7a4] ss:$48 sps:$4 sm:$0xff]  }
  0xb3   :  { %1964 = vmatprep.subr.bf16.mxu1 %v5818_v60  ;;  %v5908_v60 = vld [vmem:[#allocation5 + $0x84c] ss:$48 sps:$4 sm:$0xff]  }
  0xb5   :  { %2219 = vmatpush1.bf16.msra.mxu0 %v5891_v15  ;;  %v5981_v15 = vld [vmem:[#allocation5 + $0x7a0] ss:$48 sps:$4 sm:$0xff]  }
  0xb6   :  { %1965 = vmatpush1.bf16.msra.mxu1 %v5816_v0  ;;  %2220 = vmatprep.subr.bf16.mxu0 %v5899_v16  ;;  %v5906_v0 = vld [vmem:[#allocation5 + $0x848] ss:$48 sps:$4 sm:$0xff]   ;;  %v5989_v16 = vld [vmem:[#allocation5 + $0x804] ss:$48 sps:$4 sm:$0xff]  }
  0xb7   :  { %1966 = vmatprep.subr.bf16.mxu1 %v5824_v1  ;;  %v5914_v1 = vld [vmem:[#allocation5 + $0x8ac] ss:$48 sps:$4 sm:$0xff]  }
  0xb9   :  { %2221 = vmatpush1.bf16.msra.mxu0 %v5897_v19  ;;  %v5987_v19 = vld [vmem:[#allocation5 + $0x800] ss:$48 sps:$4 sm:$0xff]  }
  0xba   :  { %1967 = vmatpush1.bf16.msra.mxu1 %v5822_v5  ;;  %2222 = vmatprep.subr.bf16.mxu0 %v5905_v21  ;;  %v5912_v5 = vld [vmem:[#allocation5 + $0x8a8] ss:$48 sps:$4 sm:$0xff]   ;;  %v5995_v21 = vld [vmem:[#allocation5 + $0x864] ss:$48 sps:$4 sm:$0xff]  }
  0xbb   :  { %1968 = vmatprep.subr.bf16.mxu1 %v5830_v6  ;;  %v5920_v6 = vld [vmem:[#allocation5 + $0x1c] ss:$48 sps:$4 sm:$0xff]  }
  0xbd   :  { %2223 = vmatpush1.bf16.msra.mxu0 %v5903_v24  ;;  %v5993_v24 = vld [vmem:[#allocation5 + $0x860] ss:$48 sps:$4 sm:$0xff]  }
  0xbe   :  { %1969 = vmatpush1.bf16.msra.mxu1 %v5828_v9  ;;  %2224 = vmatprep.subr.bf16.mxu0 %v5911_v25  ;;  %v5918_v9 = vld [vmem:[#allocation5 + $0x18] ss:$48 sps:$4 sm:$0xff]   ;;  %v6001_v25 = vld [vmem:[#allocation5 + $0x8c4] ss:$48 sps:$4 sm:$0xff]  }
  0xbf   :  { %1970 = vmatprep.subr.bf16.mxu1 %v5836_v10  ;;  %v5926_v10 = vld [vmem:[#allocation5 + $0x7c] ss:$48 sps:$4 sm:$0xff]  }
  0xc1   :  { %2225 = vmatpush1.bf16.msra.mxu0 %v5909_v28  ;;  %v5999_v28 = vld [vmem:[#allocation5 + $0x8c0] ss:$48 sps:$4 sm:$0xff]  }
  0xc2   :  { %1971 = vmatpush1.bf16.msra.mxu1 %v5834_v13  ;;  %2226 = vmatprep.subr.bf16.mxu0 %v5917_v29  ;;  %v5924_v13 = vld [vmem:[#allocation5 + $0x78] ss:$48 sps:$4 sm:$0xff]   ;;  %v6010_v29 = vld [vmem:[#allocation7 + $0x4] ss:$12 sps:$4 sm:$0xff]  }
  0xc3   :  { %1972 = vmatprep.subr.bf16.mxu1 %v5842_v14  ;;  %v5932_v14 = vld [vmem:[#allocation5 + $0xdc] ss:$48 sps:$4 sm:$0xff]  }
  0xc5   :  { %2227 = vmatpush1.bf16.msra.mxu0 %v5915_v32  ;;  %v6008_v32 = vld [vmem:[#allocation7] ss:$12 sps:$4 sm:$0xff]  }
  0xc6   :  { %1973 = vmatpush1.bf16.msra.mxu1 %v5840_v17  ;;  %2228 = vmatprep.subr.bf16.mxu0 %v5923_v33  ;;  %v5930_v17 = vld [vmem:[#allocation5 + $0xd8] ss:$48 sps:$4 sm:$0xff]  }
  0xc7   :  { %1974 = vmatprep.subr.bf16.mxu1 %v5848_v18  ;;  %v5938_v18 = vld [vmem:[#allocation5 + $0x13c] ss:$48 sps:$4 sm:$0xff]  }
  0xc8   :  { %v6016_v33 = vld [vmem:[#allocation7 + $0x1c] ss:$12 sps:$4 sm:$0xff]  }
  0xc9   :  { %2229 = vmatpush1.bf16.msra.mxu0 %v5921_v37  ;;  %v6014_v37 = vld [vmem:[#allocation7 + $0x18] ss:$12 sps:$4 sm:$0xff]  }
  0xca   :  { %1975 = vmatpush1.bf16.msra.mxu1 %v5846_v22  ;;  %2230 = vmatprep.subr.bf16.mxu0 %v5929_v38  ;;  %v5936_v22 = vld [vmem:[#allocation5 + $0x138] ss:$48 sps:$4 sm:$0xff]   ;;  %v6022_v38 = vld [vmem:[#allocation7 + $0x34] ss:$12 sps:$4 sm:$0xff]  }
  0xcb   :  { %1976 = vmatprep.subr.bf16.mxu1 %v5854_v23  ;;  %v5944_v23 = vld [vmem:[#allocation5 + $0x19c] ss:$48 sps:$4 sm:$0xff]  }
  0xcd   :  { %2231 = vmatpush1.bf16.msra.mxu0 %v5927_v41  ;;  %v6020_v41 = vld [vmem:[#allocation7 + $0x30] ss:$12 sps:$4 sm:$0xff]  }
  0xce   :  { %1977 = vmatpush1.bf16.msra.mxu1 %v5852_v26  ;;  %2232 = vmatprep.subr.bf16.mxu0 %v5935_v42  ;;  %v5942_v26 = vld [vmem:[#allocation5 + $0x198] ss:$48 sps:$4 sm:$0xff]  }
  0xcf   :  { %1978 = vmatprep.subr.bf16.mxu1 %v5860_v27  ;;  %v5950_v27 = vld [vmem:[#allocation5 + $0x1fc] ss:$48 sps:$4 sm:$0xff]  }
  0xd0   :  { %v6028_v42 = vld [vmem:[#allocation7 + $0x4c] ss:$12 sps:$4 sm:$0xff]  }
  0xd1   :  { %2233 = vmatpush1.bf16.msra.mxu0 %v5933_v45  ;;  %v6026_v45 = vld [vmem:[#allocation7 + $0x48] ss:$12 sps:$4 sm:$0xff]  }
  0xd2   :  { %1979 = vmatpush1.bf16.msra.mxu1 %v5858_v30  ;;  %2234 = vmatprep.subr.bf16.mxu0 %v5941_v46  ;;  %v5948_v30 = vld [vmem:[#allocation5 + $0x1f8] ss:$48 sps:$4 sm:$0xff]   ;;  %v6034_v46 = vld [vmem:[#allocation7 + $0x64] ss:$12 sps:$4 sm:$0xff]  }
  0xd3   :  { %1980 = vmatprep.subr.bf16.mxu1 %v5866_v31  ;;  %v5956_v31 = vld [vmem:[#allocation5 + $0x25c] ss:$48 sps:$4 sm:$0xff]  }
  0xd5   :  { %2235 = vmatpush1.bf16.msra.mxu0 %v5939_v49  ;;  %v6032_v49 = vld [vmem:[#allocation7 + $0x60] ss:$12 sps:$4 sm:$0xff]  }
  0xd6   :  { %1981 = vmatpush1.bf16.msra.mxu1 %v5864_v35  ;;  %2236 = vmatprep.subr.bf16.mxu0 %v5947_v50  ;;  %v5954_v35 = vld [vmem:[#allocation5 + $0x258] ss:$48 sps:$4 sm:$0xff]  }
  0xd7   :  { %1993 = vmatprep.subr.bf16.mxu1 %v5872_v36  ;;  %v5962_v36 = vld [vmem:[#allocation5 + $0x2bc] ss:$48 sps:$4 sm:$0xff]  }
  0xd8   :  { %v6040_v50 = vld [vmem:[#allocation7 + $0x7c] ss:$12 sps:$4 sm:$0xff]  }
  0xd9   :  { %1983 = vmatmul.mubr.bf16.vlgmr.msra.gmra.mrb[4].mxu1 %v6667_v61  ;;  %2237 = vmatpush1.bf16.msra.mxu0 %v5945_v53  ;;  %v6038_v53 = vld [vmem:[#allocation7 + $0x78] ss:$12 sps:$4 sm:$0xff]  }
  0xda   :  { %1994 = vmatpush1.bf16.msra.mxu1 %v5870_v39  ;;  %2025 = vmatprep.mubr.bf16.mxu1 %v6592_v3  ;;  %v5960_v39 = vld [vmem:[#allocation5 + $0x2b8] ss:$48 sps:$4 sm:$0xff]  }
  0xdb   :  { %1995 = vmatprep.subr.bf16.mxu1 %v5878_v40  ;;  %2238 = vmatprep.subr.bf16.mxu0 %v5953_v54  ;;  %v5968_v40 = vld [vmem:[#allocation5 + $0x31c] ss:$48 sps:$4 sm:$0xff]   ;;  %v6046_v54 = vld [vmem:[#allocation7 + $0x94] ss:$12 sps:$4 sm:$0xff]  }
  0xdd   :  { %2239 = vmatpush1.bf16.msra.mxu0 %v5951_v57  ;;  %v6044_v57 = vld [vmem:[#allocation7 + $0x90] ss:$12 sps:$4 sm:$0xff]  }
  0xde   :  { %1996 = vmatpush1.bf16.msra.mxu1 %v5876_v43  ;;  %2251 = vmatprep.subr.bf16.mxu0 %v5959_v58  ;;  %v5966_v43 = vld [vmem:[#allocation5 + $0x318] ss:$48 sps:$4 sm:$0xff]  }
  0xdf   :  { %1997 = vmatprep.subr.bf16.mxu1 %v5884_v44  ;;  %v5974_v44 = vld [vmem:[#allocation5 + $0x37c] ss:$48 sps:$4 sm:$0xff]  }
  0xe0   :  { %2241 = vmatmul.mubr.bf16.vlgmr.msra.gmra.mrb[4].mxu0 %v6667_v61  ;;  %v6052_v58 = vld [vmem:[#allocation7 + $0xac] ss:$12 sps:$4 sm:$0xff]  }
  0xe1   :  { %2252 = vmatpush1.bf16.msra.mxu0 %v5957_v62  ;;  %2283 = vmatprep.mubr.bf16.mxu0 %v6592_v3  ;;  %v6050_v62 = vld [vmem:[#allocation7 + $0xa8] ss:$12 sps:$4 sm:$0xff]  }
  0xe2   :  { %1998 = vmatpush1.bf16.msra.mxu1 %v5882_v47  ;;  %2253 = vmatprep.subr.bf16.mxu0 %v5965_v63  ;;  %v5972_v47 = vld [vmem:[#allocation5 + $0x378] ss:$48 sps:$4 sm:$0xff]   ;;  %v6058_v63 = vld [vmem:[#allocation7 + $0xc4] ss:$12 sps:$4 sm:$0xff]  }
  0xe3   :  { %1999 = vmatprep.subr.bf16.mxu1 %v5890_v48  ;;  %v5980_v48 = vld [vmem:[#allocation5 + $0x3dc] ss:$48 sps:$4 sm:$0xff]  }
  0xe5   :  { %2254 = vmatpush1.bf16.msra.mxu0 %v5963_v2  ;;  %v6056_v2 = vld [vmem:[#allocation7 + $0xc0] ss:$12 sps:$4 sm:$0xff]  }
  0xe6   :  { %2000 = vmatpush1.bf16.msra.mxu1 %v5888_v51  ;;  %2255 = vmatprep.subr.bf16.mxu0 %v5971_v4  ;;  %v5978_v51 = vld [vmem:[#allocation5 + $0x3d8] ss:$48 sps:$4 sm:$0xff]  }
  0xe7   :  { %2001 = vmatprep.subr.bf16.mxu1 %v5896_v52  ;;  %v5986_v52 = vld [vmem:[#allocation5 + $0x43c] ss:$48 sps:$4 sm:$0xff]  }
  0xe8   :  { %v6064_v4 = vld [vmem:[#allocation7 + $0xdc] ss:$12 sps:$4 sm:$0xff]  }
  0xe9   :  { %2256 = vmatpush1.bf16.msra.mxu0 %v5969_v7  ;;  %v6062_v7 = vld [vmem:[#allocation7 + $0xd8] ss:$12 sps:$4 sm:$0xff]  }
  0xea   :  { %2002 = vmatpush1.bf16.msra.mxu1 %v5894_v55  ;;  %2257 = vmatprep.subr.bf16.mxu0 %v5977_v8  ;;  %v5984_v55 = vld [vmem:[#allocation5 + $0x438] ss:$48 sps:$4 sm:$0xff]   ;;  %v6070_v8 = vld [vmem:[#allocation7 + $0xf4] ss:$12 sps:$4 sm:$0xff]  }
  0xeb   :  { %2003 = vmatprep.subr.bf16.mxu1 %v5902_v56  ;;  %v5992_v56 = vld [vmem:[#allocation5 + $0x49c] ss:$48 sps:$4 sm:$0xff]  }
  0xed   :  { %2258 = vmatpush1.bf16.msra.mxu0 %v5975_v11  ;;  %v6068_v11 = vld [vmem:[#allocation7 + $0xf0] ss:$12 sps:$4 sm:$0xff]  }
  0xee   :  { %2004 = vmatpush1.bf16.msra.mxu1 %v5900_v59  ;;  %2259 = vmatprep.subr.bf16.mxu0 %v5983_v12  ;;  %v5990_v59 = vld [vmem:[#allocation5 + $0x498] ss:$48 sps:$4 sm:$0xff]  }
  0xef   :  { %2005 = vmatprep.subr.bf16.mxu1 %v5908_v60  ;;  %v5998_v60 = vld [vmem:[#allocation5 + $0x4fc] ss:$48 sps:$4 sm:$0xff]   ;;  %v6011_v12 = vld [vmem:[#allocation5 + $0x618] ss:$48 sps:$4 sm:$0xff]  }
  0xf1   :  { %2260 = vmatpush1.bf16.msra.mxu0 %v5981_v15  ;;  %v6074_v15 = vld [vmem:[#allocation7 + $0x108] ss:$12 sps:$4 sm:$0xff]  }
  0xf2   :  { %2006 = vmatpush1.bf16.msra.mxu1 %v5906_v0  ;;  %2261 = vmatprep.subr.bf16.mxu0 %v5989_v16  ;;  %v5996_v0 = vld [vmem:[#allocation5 + $0x4f8] ss:$48 sps:$4 sm:$0xff]   ;;  %v6082_v16 = vld [vmem:[#allocation7 + $0x124] ss:$12 sps:$4 sm:$0xff]  }
  0xf3   :  { %2007 = vmatprep.subr.bf16.mxu1 %v5914_v1  ;;  %v6004_v1 = vld [vmem:[#allocation5 + $0x55c] ss:$48 sps:$4 sm:$0xff]  }
  0xf5   :  { %2262 = vmatpush1.bf16.msra.mxu0 %v5987_v19  ;;  %v6080_v19 = vld [vmem:[#allocation7 + $0x120] ss:$12 sps:$4 sm:$0xff]  }
  0xf6   :  { %2008 = vmatpush1.bf16.msra.mxu1 %v5912_v5  ;;  %2263 = vmatprep.subr.bf16.mxu0 %v5995_v21  ;;  %v6002_v5 = vld [vmem:[#allocation5 + $0x558] ss:$48 sps:$4 sm:$0xff]  }
  0xf7   :  { %2122 = vmatprep.subr.bf16.mxu1 %v5920_v6  ;;  %v6007_v6 = vld [vmem:[#allocation5 + $0x5bc] ss:$48 sps:$4 sm:$0xff]  }
  0xf8   :  { %v6088_v21 = vld [vmem:[#allocation7 + $0x13c] ss:$12 sps:$4 sm:$0xff]  }
  0xf9   :  { %2026 = vmatmul.mubr.bf16.vlgmr.msra.gmra.mrb[4].mxu1 %v6673_v34  ;;  %2264 = vmatpush1.bf16.msra.mxu0 %v5993_v24  ;;  %v6086_v24 = vld [vmem:[#allocation7 + $0x138] ss:$12 sps:$4 sm:$0xff]  }
  0xfa   :  { %2123 = vmatpush1.bf16.msra.mxu1 %v5918_v9  ;;  %2154 = vmatprep.mubr.bf16.mxu1 %v6663_v20  ;;  %v6005_v9 = vld [vmem:[#allocation5 + $0x5b8] ss:$48 sps:$4 sm:$0xff]  }
  0xfb   :  { %2124 = vmatprep.subr.bf16.mxu1 %v5926_v10  ;;  %2265 = vmatprep.subr.bf16.mxu0 %v6001_v25  ;;  %v6013_v10 = vld [vmem:[#allocation5 + $0x61c] ss:$48 sps:$4 sm:$0xff]   ;;  %v6094_v25 = vld [vmem:[#allocation7 + $0x154] ss:$12 sps:$4 sm:$0xff]  }
  0xfd   :  { %2266 = vmatpush1.bf16.msra.mxu0 %v5999_v28  ;;  %v6092_v28 = vld [vmem:[#allocation7 + $0x150] ss:$12 sps:$4 sm:$0xff]  }
  0xfe   :  { %2125 = vmatpush1.bf16.msra.mxu1 %v5924_v13  ;;  %4353 = vmatprep.subr.bf16.mxu0 %v6010_v29  ;;  %v6076_v13 = vld [vmem:[#allocation7 + $0x10c] ss:$12 sps:$4 sm:$0xff]  }
  0xff   :  { %2126 = vmatprep.subr.bf16.mxu1 %v5932_v14  ;;  %v6019_v14 = vld [vmem:[#allocation5 + $0x67c] ss:$48 sps:$4 sm:$0xff]  }
 0x100   :  { %2284 = vmatmul.mubr.bf16.vlgmr.msra.gmra.mrb[4].mxu0 %v6673_v34  ;;  %v6100_v29 = vld [vmem:[#allocation7 + $0x16c] ss:$12 sps:$4 sm:$0xff]  }
 0x101   :  { %4354 = vmatpush1.bf16.msra.mxu0 %v6008_v32  ;;  %v6098_v32 = vld [vmem:[#allocation7 + $0x168] ss:$12 sps:$4 sm:$0xff]  }
 0x102   :  { %2127 = vmatpush1.bf16.msra.mxu1 %v5930_v17  ;;  %4355 = vmatprep.subr.bf16.mxu0 %v6016_v33  ;;  %v6017_v17 = vld [vmem:[#allocation5 + $0x678] ss:$48 sps:$4 sm:$0xff]   ;;  %v6130_v33 = vld [vmem:[#allocation7 + $0x184] ss:$12 sps:$4 sm:$0xff]  }
 0x103   :  { %2128 = vmatprep.subr.bf16.mxu1 %v5938_v18  ;;  %v6025_v18 = vld [vmem:[#allocation5 + $0x6dc] ss:$48 sps:$4 sm:$0xff]  }
 0x105   :  { %4356 = vmatpush1.bf16.msra.mxu0 %v6014_v37  ;;  %v6047_v37 = vld [vmem:[#allocation5 + $0x858] ss:$48 sps:$4 sm:$0xff]  }
 0x106   :  { %2129 = vmatpush1.bf16.msra.mxu1 %v5936_v22  ;;  %4357 = vmatprep.subr.bf16.mxu0 %v6022_v38  ;;  %v6023_v22 = vld [vmem:[#allocation5 + $0x6d8] ss:$48 sps:$4 sm:$0xff]   ;;  %v6055_v38 = vld [vmem:[#allocation5 + $0x8bc] ss:$48 sps:$4 sm:$0xff]  }
 0x107   :  { %2130 = vmatprep.subr.bf16.mxu1 %v5944_v23  ;;  %v6031_v23 = vld [vmem:[#allocation5 + $0x73c] ss:$48 sps:$4 sm:$0xff]  }
 0x109   :  { %4358 = vmatpush1.bf16.msra.mxu0 %v6020_v41  ;;  %v6059_v41 = vld [vmem:[#allocation5 + $0x28] ss:$48 sps:$4 sm:$0xff]  }
 0x10a   :  { %2131 = vmatpush1.bf16.msra.mxu1 %v5942_v26  ;;  %4359 = vmatprep.subr.bf16.mxu0 %v6028_v42  ;;  %v6029_v26 = vld [vmem:[#allocation5 + $0x738] ss:$48 sps:$4 sm:$0xff]   ;;  %v6067_v42 = vld [vmem:[#allocation5 + $0x8c] ss:$48 sps:$4 sm:$0xff]  }
 0x10b   :  { %2132 = vmatprep.subr.bf16.mxu1 %v5950_v27  ;;  %v6037_v27 = vld [vmem:[#allocation5 + $0x79c] ss:$48 sps:$4 sm:$0xff]  }
 0x10d   :  { %4360 = vmatpush1.bf16.msra.mxu0 %v6026_v45  ;;  %v6071_v45 = vld [vmem:[#allocation5 + $0xe8] ss:$48 sps:$4 sm:$0xff]  }
 0x10e   :  { %2133 = vmatpush1.bf16.msra.mxu1 %v5948_v30  ;;  %4361 = vmatprep.subr.bf16.mxu0 %v6034_v46  ;;  %v6035_v30 = vld [vmem:[#allocation5 + $0x798] ss:$48 sps:$4 sm:$0xff]   ;;  %v364_v46 = vlaneseq }
 0x10f   :  { %2134 = vmatprep.subr.bf16.mxu1 %v5956_v31  ;;  %v6043_v31 = vld [vmem:[#allocation5 + $0x7fc] ss:$48 sps:$4 sm:$0xff]  }
 0x111   :  { %4362 = vmatpush1.bf16.msra.mxu0 %v6032_v49  ;;  %v6690_v49 = vshrl.u32 %v364_v46, 7  ;;  %v6116_v46 = vld [vmem:[#allocation5 + $0x4a8] ss:$48 sps:$4 sm:$0xff]  }
 0x112   :  { %2135 = vmatpush1.bf16.msra.mxu1 %v5954_v35  ;;  %4363 = vmatprep.subr.bf16.mxu0 %v6040_v50  ;;  %v6041_v35 = vld [vmem:[#allocation5 + $0x7f8] ss:$48 sps:$4 sm:$0xff]   ;;  %v6085_v50 = vld [vmem:[#allocation5 + $0x1ac] ss:$48 sps:$4 sm:$0xff]  }
 0x113   :  { %2136 = vmatprep.subr.bf16.mxu1 %v5962_v36  ;;  %v6049_v36 = vld [vmem:[#allocation5 + $0x85c] ss:$48 sps:$4 sm:$0xff]  }
 0x115   :  { %4364 = vmatpush1.bf16.msra.mxu0 %v6038_v53  ;;  %v6091_v53 = vld [vmem:[#allocation5 + $0x20c] ss:$48 sps:$4 sm:$0xff]  }
 0x116   :  { %2137 = vmatpush1.bf16.msra.mxu1 %v5960_v39  ;;  %4365 = vmatprep.subr.bf16.mxu0 %v6046_v54  ;;  %v6053_v39 = vld [vmem:[#allocation5 + $0x8b8] ss:$48 sps:$4 sm:$0xff]   ;;  %v6701_v54 = vsub.s32 1, %v6690_v49 }
 0x117   :  { %2138 = vmatprep.subr.bf16.mxu1 %v5968_v40  ;;  %v6061_v40 = vld [vmem:[#allocation5 + $0x2c] ss:$48 sps:$4 sm:$0xff]  }
 0x119   :  { %4366 = vmatpush1.bf16.msra.mxu0 %v6044_v57  ;;  %v6097_v57 = vld [vmem:[#allocation5 + $0x26c] ss:$48 sps:$4 sm:$0xff]  }
 0x11a   :  { %2139 = vmatpush1.bf16.msra.mxu1 %v5966_v43  ;;  %4367 = vmatprep.subr.bf16.mxu0 %v6052_v58  ;;  %v6065_v43 = vld [vmem:[#allocation5 + $0x88] ss:$48 sps:$4 sm:$0xff]  }
 0x11b   :  { %2140 = vmatprep.subr.bf16.mxu1 %v5974_v44  ;;  %v6073_v44 = vld [vmem:[#allocation5 + $0xec] ss:$48 sps:$4 sm:$0xff]  }
 0x11d   :  { %4368 = vmatpush1.bf16.msra.mxu0 %v6050_v62 }
 0x11e   :  { %2141 = vmatpush1.bf16.msra.mxu1 %v5972_v47  ;;  %4369 = vmatprep.subr.bf16.mxu0 %v6058_v63  ;;  %v6079_v47 = vld [vmem:[#allocation5 + $0x14c] ss:$48 sps:$4 sm:$0xff]   ;;  %v6095_v63 = vld [vmem:[#allocation5 + $0x268] ss:$48 sps:$4 sm:$0xff]  }
 0x11f   :  { %2142 = vmatprep.subr.bf16.mxu1 %v5980_v48  ;;  %v6077_v48 = vld [vmem:[#allocation5 + $0x148] ss:$48 sps:$4 sm:$0xff]  }
 0x121   :  { %4370 = vmatpush1.bf16.msra.mxu0 %v6056_v2 }
 0x122   :  { %2143 = vmatpush1.bf16.msra.mxu1 %v5978_v51  ;;  %4371 = vmatprep.subr.bf16.mxu0 %v6064_v4  ;;  %v6083_v51 = vld [vmem:[#allocation5 + $0x1a8] ss:$48 sps:$4 sm:$0xff]  }
 0x123   :  { %2144 = vmatprep.subr.bf16.mxu1 %v5986_v52  ;;  %v6695_v52 = vld [vmem:[%s6801_s2] sm:$0xff] }
 0x124   :  { %v371_v58 = vrot.slane %v6695_v52, %v6701_v54 }
 0x125   :  { %4372 = vmatpush1.bf16.msra.mxu0 %v6062_v7  ;;  %v6101_v7 = vld [vmem:[#allocation5 + $0x2c8] ss:$48 sps:$4 sm:$0xff]  }
 0x126   :  { %2145 = vmatpush1.bf16.msra.mxu1 %v5984_v55  ;;  %4373 = vmatprep.subr.bf16.mxu0 %v6070_v8  ;;  %v6089_v55 = vld [vmem:[#allocation5 + $0x208] ss:$48 sps:$4 sm:$0xff]  }
 0x127   :  { %2146 = vmatprep.subr.bf16.mxu1 %v5992_v56 }
 0x129   :  { %4374 = vmatpush1.bf16.msra.mxu0 %v6068_v11  ;;  %v6106_v11 = vld [vmem:[#allocation5 + $0x32c] ss:$48 sps:$4 sm:$0xff]  }
 0x12a   :  { %2147 = vmatpush1.bf16.msra.mxu1 %v5990_v59  ;;  %4375 = vmatprep.subr.bf16.mxu0 %v6076_v13 }
 0x12b   :  { %2148 = vmatprep.subr.bf16.mxu1 %v5998_v60 }
 0x12d   :  { %4376 = vmatpush1.bf16.msra.mxu0 %v6074_v15  ;;  %v6104_v15 = vld [vmem:[#allocation5 + $0x328] ss:$48 sps:$4 sm:$0xff]  }
 0x12e   :  { %2149 = vmatpush1.bf16.msra.mxu1 %v5996_v0  ;;  %4377 = vmatprep.subr.bf16.mxu0 %v6082_v16  ;;  %v6103_v0 = vld [vmem:[#allocation5 + $0x2cc] ss:$48 sps:$4 sm:$0xff]  }
 0x12f   :  { %2150 = vmatprep.subr.bf16.mxu1 %v6004_v1  ;;  %v6128_v16 = vld [vmem:[#allocation7 + $0x180] ss:$12 sps:$4 sm:$0xff]  }
 0x131   :  { %4378 = vmatpush1.bf16.msra.mxu0 %v6080_v19  ;;  %v6134_v19 = vld [vmem:[#allocation7 + $0x198] ss:$12 sps:$4 sm:$0xff]  }
 0x132   :  { %2151 = vmatpush1.bf16.msra.mxu1 %v6002_v5  ;;  %4379 = vmatprep.subr.bf16.mxu0 %v6088_v21  ;;  %v6107_v21 = vld [vmem:[#allocation5 + $0x388] ss:$48 sps:$4 sm:$0xff]  }
 0x133   :  { %2152 = vmatprep.subr.bf16.mxu1 %v6007_v6 }
 0x135   :  { %4380 = vmatpush1.bf16.msra.mxu0 %v6086_v24  ;;  %v382_v24 = vsub.s32 4, %v6690_v49 }
 0x136   :  { %2153 = vmatpush1.bf16.msra.mxu1 %v6005_v9  ;;  %4381 = vmatprep.subr.bf16.mxu0 %v6094_v25  ;;  %v386_v25 = vsub.s32 5, %v6690_v49 }
 0x137   :  { %2165 = vmatprep.subr.bf16.mxu1 %v6013_v10 }
 0x139   :  { %2155 = vmatmul.mubr.bf16.vlgmr.msra.gmra.mrb[8].mxu1 %v6667_v61  ;;  %4382 = vmatpush1.bf16.msra.mxu0 %v6092_v28  ;;  %v6115_v28 = vld [vmem:[#allocation5 + $0x44c] ss:$48 sps:$4 sm:$0xff]  }
 0x13a   :  { %2166 = vmatpush1.bf16.msra.mxu1 %v6011_v12  ;;  %2197 = vmatprep.mubr.bf16.mxu1 %v6592_v3 }
 0x13b   :  { %2167 = vmatprep.subr.bf16.mxu1 %v6019_v14  ;;  %4383 = vmatprep.subr.bf16.mxu0 %v6100_v29  ;;  %v6148_v29 = vld [vmem:[#allocation7 + $0x1cc] ss:$12 sps:$4 sm:$0xff]  }
 0x13d   :  { %4384 = vmatpush1.bf16.msra.mxu0 %v6098_v32  ;;  %v6113_v32 = vld [vmem:[#allocation5 + $0x448] ss:$48 sps:$4 sm:$0xff]  }
 0x13e   :  { %2168 = vmatpush1.bf16.msra.mxu1 %v6017_v17  ;;  %4396 = vmatprep.subr.bf16.mxu0 %v6130_v33  ;;  %v6109_v17 = vld [vmem:[#allocation5 + $0x38c] ss:$48 sps:$4 sm:$0xff]   ;;  %v6146_v33 = vld [vmem:[#allocation7 + $0x1c8] ss:$12 sps:$4 sm:$0xff]  }
 0x13f   :  { %2169 = vmatprep.subr.bf16.mxu1 %v6025_v18  ;;  %v6136_v18 = vld [vmem:[#allocation7 + $0x19c] ss:$12 sps:$4 sm:$0xff]  }
 0x142   :  { %2170 = vmatpush1.bf16.msra.mxu1 %v6023_v22  ;;  %v6112_v22 = vld [vmem:[#allocation5 + $0x3ec] ss:$48 sps:$4 sm:$0xff]  }
 0x143   :  { %2171 = vmatprep.subr.bf16.mxu1 %v6031_v23  ;;  %v6142_v23 = vld [vmem:[#allocation7 + $0x1b4] ss:$12 sps:$4 sm:$0xff]  }
 0x146   :  { %2172 = vmatpush1.bf16.msra.mxu1 %v6029_v26  ;;  %v6110_v26 = vld [vmem:[#allocation5 + $0x3e8] ss:$48 sps:$4 sm:$0xff]  }
 0x147   :  { %2173 = vmatprep.subr.bf16.mxu1 %v6037_v27  ;;  %v6140_v27 = vld [vmem:[#allocation7 + $0x1b0] ss:$12 sps:$4 sm:$0xff]  }
 0x14a   :  { %2174 = vmatpush1.bf16.msra.mxu1 %v6035_v30  ;;  %v383_v30 = vrot.slane %v6695_v52, %v382_v24  ;;  %v6190_v24 = vld [vmem:[#allocation7 + $0x288] ss:$12 sps:$4 sm:$0xff]  }
 0x14b   :  { %2175 = vmatprep.subr.bf16.mxu1 %v6043_v31  ;;  %v387_v31 = vrot.slane %v6695_v52, %v386_v25  ;;  %v6197_v25 = vld [vmem:[#allocation7 + $0x2a4] ss:$12 sps:$4 sm:$0xff]  }
 0x14e   :  { %2176 = vmatpush1.bf16.msra.mxu1 %v6041_v35  ;;  %v6118_v35 = vld [vmem:[#allocation5 + $0x4ac] ss:$48 sps:$4 sm:$0xff]  }
 0x14f   :  { %2177 = vmatprep.subr.bf16.mxu1 %v6049_v36  ;;  %v6154_v36 = vld [vmem:[#allocation7 + $0x1e4] ss:$12 sps:$4 sm:$0xff]  }
 0x152   :  { %2178 = vmatpush1.bf16.msra.mxu1 %v6047_v37 }
 0x153   :  { %2179 = vmatprep.subr.bf16.mxu1 %v6055_v38 }
 0x156   :  { %2180 = vmatpush1.bf16.msra.mxu1 %v6053_v39 }
 0x157   :  { %2294 = vmatprep.subr.bf16.mxu1 %v6061_v40 }
 0x159   :  { %2198 = vmatmul.mubr.bf16.vlgmr.msra.gmra.mrb[8].mxu1 %v6673_v34 }
 0x15a   :  { %2295 = vmatpush1.bf16.msra.mxu1 %v6059_v41  ;;  %2326 = vmatprep.mubr.bf16.mxu1 %v6663_v20  ;;  %v6698_v20 = vsub.s32 0, %v6690_v49 }
 0x15b   :  { %2296 = vmatprep.subr.bf16.mxu1 %v6067_v42  ;;  %v6152_v42 = vld [vmem:[#allocation7 + $0x1e0] ss:$12 sps:$4 sm:$0xff]  }
 0x15c   :  { %v367_v56 = vrot.slane %v6695_v52, %v6698_v20 }
 0x15e   :  { %2297 = vmatpush1.bf16.msra.mxu1 %v6065_v43 }
 0x15f   :  { %2298 = vmatprep.subr.bf16.mxu1 %v6073_v44 }
 0x162   :  { %2299 = vmatpush1.bf16.msra.mxu1 %v6071_v45 }
 0x163   :  { %2300 = vmatprep.subr.bf16.mxu1 %v6079_v47 }
 0x166   :  { %2301 = vmatpush1.bf16.msra.mxu1 %v6077_v48 }
 0x167   :  { %2302 = vmatprep.subr.bf16.mxu1 %v6085_v50  ;;  %v6160_v50 = vld [vmem:[#allocation7 + $0x1fc] ss:$12 sps:$4 sm:$0xff]  }
 0x16a   :  { %2303 = vmatpush1.bf16.msra.mxu1 %v6083_v51  ;;  %v6121_v51 = vld [vmem:[#allocation5 + $0x50c] ss:$48 sps:$4 sm:$0xff]  }
 0x16b   :  { %2304 = vmatprep.subr.bf16.mxu1 %v6091_v53 }
 0x16c   :  { %v1941_v59 = vpop.f32.mrb[0].mxu1 }
 0x16d   :  { %v5589_v60 = vadd.f32 %v1941_v59, %v367_v56  ;;  %v1943_v62 = vpop.f32.mrb[1].mxu1  ;;  %v6124_v59 = vld [vmem:[#allocation5 + $0x56c] ss:$48 sps:$4 sm:$0xff]  }
 0x16e   :  { %v5590_v1 = vadd.f32 %v1943_v62, %v371_v58  ;;  %v1945_v2 = vpop.f32.mrb[2].mxu1  ;;  %2305 = vmatpush1.bf16.msra.mxu1 %v6089_v55  ;;  %v6166_v62 = vld [vmem:[#allocation7 + $0x214] ss:$12 sps:$4 sm:$0xff]  }
 0x16f   :  { %v5591_v4 = vadd.f32 %v1945_v2, %v367_v56  ;;  %v1947_v5 = vpop.f32.mrb[3].mxu1  ;;  %2306 = vmatprep.subr.bf16.mxu1 %v6097_v57  ;;  %v2380_v8 = vmax.f32 %v5589_v60, 0.0  ;;  %v6119_v56 = vld [vmem:[#allocation5 + $0x508] ss:$48 sps:$4 sm:$0xff]  }
 0x170   :  { %v5592_v6 = vadd.f32 %v1947_v5, %v371_v58  ;;  %v2381_v9 = vmax.f32 %v5590_v1, 0.0  ;;  %v6158_v58 = vld [vmem:[#allocation7 + $0x1f8] ss:$12 sps:$4 sm:$0xff]   ;;  %v6127_v1 = vld [vmem:[#allocation5 + $0x5cc] ss:$48 sps:$4 sm:$0xff]  }
 0x171   :  { %v2392_v10 = vmax.f32 %v5591_v4, 0.0  ;;  %v6172_v2 = vld [vmem:[#allocation7 + $0x22c] ss:$12 sps:$4 sm:$0xff]   ;;  %v6170_v5 = vld [vmem:[#allocation7 + $0x228] ss:$12 sps:$4 sm:$0xff]  }
 0x172   :  { %v2393_v12 = vmax.f32 %v5592_v6, 0.0  ;;  %2307 = vmatpush1.bf16.msra.mxu1 %v6095_v63  ;;  %v6122_v63 = vld [vmem:[#allocation5 + $0x568] ss:$48 sps:$4 sm:$0xff]   ;;  %v6133_v6 = vld [vmem:[#allocation5 + $0x62c] ss:$48 sps:$4 sm:$0xff]  }
 0x173   :  { %v6707_v13 = vpack.c.bf16 %v2392_v10, %v2380_v8  ;;  %2308 = vmatprep.subr.bf16.mxu1 %v6103_v0  ;;  %v2113_v37 = vpop.f32.mrb[0].mxu0  ;;  %v6164_v0 = vld [vmem:[#allocation7 + $0x210] ss:$12 sps:$4 sm:$0xff]   ;;  %v6125_v4 = vld [vmem:[#allocation5 + $0x5c8] ss:$48 sps:$4 sm:$0xff]  }
 0x174   :  { %v6709_v14 = vpack.c.bf16 %v2393_v12, %v2381_v9  ;;  %v5597_v38 = vadd.f32 %v2113_v37, %v383_v30  ;;  %v2115_v39 = vpop.f32.mrb[1].mxu0  ;;  %v6176_v8 = vld [vmem:[#allocation7 + $0x240] ss:$12 sps:$4 sm:$0xff]   ;;  %v6131_v9 = vld [vmem:[#allocation5 + $0x628] ss:$48 sps:$4 sm:$0xff]  }
 0x175   :  { %v5598_v40 = vadd.f32 %v2115_v39, %v387_v31  ;;  %v2117_v41 = vpop.f32.mrb[2].mxu0  ;;  %v6182_v10 = vld [vmem:[#allocation7 + $0x25c] ss:$12 sps:$4 sm:$0xff]   ;;  %v6180_v12 = vld [vmem:[#allocation7 + $0x258] ss:$12 sps:$4 sm:$0xff]  }
 0x176   :  { %2309 = vmatpush1.bf16.msra.mxu1 %v6101_v7  ;;  %4385 = vmatprep.mubr.bf16.mxu0 %v6709_v14  ;;  %v2384_v43 = vmax.f32 %v5597_v38, 0.0  ;;  %v5599_v44 = vadd.f32 %v2117_v41, %v383_v30  ;;  %v2119_v45 = vpop.f32.mrb[3].mxu0  ;;  %v6178_v7 = vld [vmem:[#allocation7 + $0x244] ss:$12 sps:$4 sm:$0xff]   ;;  %v6175_v37 = vld [vmem:[#allocation5 + $0x8cc] ss:$48 sps:$4 sm:$0xff]  }
 0x177   :  { %4386 = vmatmul.mubr.bf16.vlgmr.msra.gmra.mrb[8].mxu0 %v6707_v13  ;;  %2310 = vmatprep.subr.bf16.mxu1 %v6106_v11  ;;  %v2385_v47 = vmax.f32 %v5598_v40, 0.0  ;;  %v5600_v48 = vadd.f32 %v2119_v45, %v387_v31  ;;  %v6139_v11 = vld [vmem:[#allocation5 + $0x68c] ss:$48 sps:$4 sm:$0xff]   ;;  %v6200_v30 = vld [vmem:[#allocation7 + $0x2b8] ss:$12 sps:$4 sm:$0xff]  }
 0x178   :  { %4397 = vmatpush1.bf16.msra.mxu0 %v6128_v16  ;;  %v2396_v53 = vmax.f32 %v5599_v44, 0.0  ;;  %v6145_v16 = vld [vmem:[#allocation5 + $0x6ec] ss:$48 sps:$4 sm:$0xff]   ;;  %v6210_v38 = vld [vmem:[#allocation7 + $0x2e8] ss:$12 sps:$4 sm:$0xff]  }
 0x179   :  { %4398 = vmatprep.subr.bf16.mxu0 %v6136_v18  ;;  %v2397_v55 = vmax.f32 %v5600_v48, 0.0  ;;  %v6143_v18 = vld [vmem:[#allocation5 + $0x6e8] ss:$48 sps:$4 sm:$0xff]   ;;  %v6169_v31 = vld [vmem:[#allocation5 + $0x86c] ss:$48 sps:$4 sm:$0xff]  }
 0x17a   :  { %2311 = vmatpush1.bf16.msra.mxu1 %v6104_v15  ;;  %v6717_v57 = vpack.c.bf16 %v2396_v53, %v2384_v43  ;;  %v6137_v15 = vld [vmem:[#allocation5 + $0x688] ss:$48 sps:$4 sm:$0xff]   ;;  %v6217_v40 = vld [vmem:[#allocation7 + $0x304] ss:$12 sps:$4 sm:$0xff]   ;;  %v6184_v43 = vld [vmem:[#allocation7 + $0xe0] ss:$12 sps:$4 sm:$0xff]  }
 0x17b   :  { %2312 = vmatprep.subr.bf16.mxu1 %v6109_v17  ;;  %v6719_v60 = vpack.c.bf16 %v2397_v55, %v2385_v47  ;;  %v6187_v17 = vld [vmem:[#allocation7 + $0x274] ss:$12 sps:$4 sm:$0xff]   ;;  %v6173_v39 = vld [vmem:[#allocation5 + $0x8c8] ss:$48 sps:$4 sm:$0xff]   ;;  %v6194_v47 = vld [vmem:[#allocation7 + $0x110] ss:$12 sps:$4 sm:$0xff]  }
 0x17c   :  { %4399 = vmatpush1.bf16.msra.mxu0 %v6134_v19  ;;  %v6185_v19 = vld [vmem:[#allocation7 + $0x270] ss:$12 sps:$4 sm:$0xff]   ;;  %v6179_v41 = vld [vmem:[#allocation7 + $0xc8] ss:$12 sps:$4 sm:$0xff]   ;;  %v6188_v44 = vld [vmem:[#allocation7 + $0x20] ss:$12 sps:$4 sm:$0xff]  }
 0x17d   :  { %4400 = vmatprep.subr.bf16.mxu0 %v6142_v23  ;;  %v6149_v23 = vld [vmem:[#allocation5 + $0x748] ss:$48 sps:$4 sm:$0xff]   ;;  %v6198_v48 = vld [vmem:[#allocation7 + $0x50] ss:$12 sps:$4 sm:$0xff]  }
 0x17e   :  { %2313 = vmatpush1.bf16.msra.mxu1 %v6107_v21  ;;  %v6151_v21 = vld [vmem:[#allocation5 + $0x74c] ss:$48 sps:$4 sm:$0xff]   ;;  %v6189_v45 = vld [vmem:[#allocation7 + $0xf8] ss:$12 sps:$4 sm:$0xff]   ;;  %v6203_v53 = vld [vmem:[#allocation7 + $0x68] ss:$12 sps:$4 sm:$0xff]  }
 0x17f   :  { %2314 = vmatprep.subr.bf16.mxu1 %v6112_v22  ;;  %v6192_v22 = vld [vmem:[#allocation7 + $0x28c] ss:$12 sps:$4 sm:$0xff]  }
 0x180   :  { %4401 = vmatpush1.bf16.msra.mxu0 %v6140_v27  ;;  %v6163_v27 = vld [vmem:[#allocation5 + $0x80c] ss:$48 sps:$4 sm:$0xff]  }
 0x181   :  { %4402 = vmatprep.subr.bf16.mxu0 %v6148_v29  ;;  %v6161_v29 = vld [vmem:[#allocation5 + $0x808] ss:$48 sps:$4 sm:$0xff]  }
 0x182   :  { %2315 = vmatpush1.bf16.msra.mxu1 %v6110_v26  ;;  %v6155_v26 = vld [vmem:[#allocation5 + $0x7a8] ss:$48 sps:$4 sm:$0xff]  }
 0x183   :  { %2316 = vmatprep.subr.bf16.mxu1 %v6115_v28  ;;  %v6202_v28 = vld [vmem:[#allocation7 + $0x2bc] ss:$12 sps:$4 sm:$0xff]  }
 0x184   :  { %4403 = vmatpush1.bf16.msra.mxu0 %v6146_v33  ;;  %v6205_v33 = vld [vmem:[#allocation7 + $0x2d0] ss:$12 sps:$4 sm:$0xff]  }
 0x185   :  { %4404 = vmatprep.subr.bf16.mxu0 %v6154_v36  ;;  %v6212_v36 = vld [vmem:[#allocation7 + $0x2ec] ss:$12 sps:$4 sm:$0xff]  }
 0x186   :  { %2317 = vmatpush1.bf16.msra.mxu1 %v6113_v32  ;;  %v6207_v32 = vld [vmem:[#allocation7 + $0x2d4] ss:$12 sps:$4 sm:$0xff]  }
 0x187   :  { %2318 = vmatprep.subr.bf16.mxu1 %v6118_v35  ;;  %v6167_v35 = vld [vmem:[#allocation5 + $0x868] ss:$48 sps:$4 sm:$0xff]  }
 0x188   :  { %4405 = vmatpush1.bf16.msra.mxu0 %v6152_v42  ;;  %v6183_v42 = vld [vmem:[#allocation7 + $0x8] ss:$12 sps:$4 sm:$0xff]  }
 0x189   :  { %4406 = vmatprep.subr.bf16.mxu0 %v6160_v50  ;;  %v6199_v50 = vld [vmem:[#allocation7 + $0x128] ss:$12 sps:$4 sm:$0xff]  }
 0x18a   :  { %2319 = vmatpush1.bf16.msra.mxu1 %v6116_v46  ;;  %v6193_v46 = vld [vmem:[#allocation7 + $0x38] ss:$12 sps:$4 sm:$0xff]  }
 0x18b   :  { %2320 = vmatprep.subr.bf16.mxu1 %v6121_v51  ;;  %v6726_v51 = vsub.s32 2, %v6690_v49 }
 0x18c   :  { %4407 = vmatpush1.bf16.msra.mxu0 %v6158_v58  ;;  %v6208_v58 = vld [vmem:[#allocation7 + $0x80] ss:$12 sps:$4 sm:$0xff]  }
 0x18d   :  { %4408 = vmatprep.subr.bf16.mxu0 %v6166_v62  ;;  %v375_v55 = vrot.slane %v6695_v52, %v6726_v51 }
 0x18e   :  { %2321 = vmatpush1.bf16.msra.mxu1 %v6119_v56 }
 0x18f   :  { %2322 = vmatprep.subr.bf16.mxu1 %v6124_v59  ;;  %v6209_v59 = vld [vmem:[#allocation7 + $0x158] ss:$12 sps:$4 sm:$0xff]  }
 0x190   :  { %4409 = vmatpush1.bf16.msra.mxu0 %v6164_v0 }
 0x191   :  { %4410 = vmatprep.subr.bf16.mxu0 %v6172_v2 }
 0x192   :  { %2323 = vmatpush1.bf16.msra.mxu1 %v6122_v63 }
 0x193   :  { %2324 = vmatprep.subr.bf16.mxu1 %v6127_v1 }
 0x194   :  { %4411 = vmatpush1.bf16.msra.mxu0 %v6170_v5 }
 0x195   :  { %4412 = vmatprep.subr.bf16.mxu0 %v6178_v7  ;;  %v6214_v7 = vld [vmem:[#allocation7 + $0x170] ss:$12 sps:$4 sm:$0xff]  }
 0x196   :  { %2325 = vmatpush1.bf16.msra.mxu1 %v6125_v4  ;;  %v6213_v4 = vld [vmem:[#allocation7 + $0x98] ss:$12 sps:$4 sm:$0xff]  }
 0x197   :  { %2337 = vmatprep.subr.bf16.mxu1 %v6133_v6 }
 0x198   :  { %4413 = vmatpush1.bf16.msra.mxu0 %v6176_v8 }
 0x199   :  { %2327 = vmatmul.mubr.bf16.vlgmr.msra.gmra.mrb[12].mxu1 %v6667_v61  ;;  %4414 = vmatprep.subr.bf16.mxu0 %v6182_v10  ;;  %v6157_v61 = vld [vmem:[#allocation5 + $0x7ac] ss:$48 sps:$4 sm:$0xff]  }
 0x19a   :  { %2338 = vmatpush1.bf16.msra.mxu1 %v6131_v9  ;;  %2369 = vmatprep.mubr.bf16.mxu1 %v6592_v3  ;;  %v6195_v3 = vld [vmem:[#allocation7 + $0x2a0] ss:$12 sps:$4 sm:$0xff]  }
 0x19b   :  { %2339 = vmatprep.subr.bf16.mxu1 %v6139_v11 }
 0x19c   :  { %4415 = vmatpush1.bf16.msra.mxu0 %v6180_v12 }
 0x19d   :  { %4416 = vmatprep.subr.bf16.mxu0 %v6187_v17 }
 0x19e   :  { %2340 = vmatpush1.bf16.msra.mxu1 %v6137_v15 }
 0x19f   :  { %2341 = vmatprep.subr.bf16.mxu1 %v6145_v16  ;;  %v6219_v16 = vld [vmem:[#allocation7 + $0x248] ss:$12 sps:$4 sm:$0xff]  }
 0x1a0   :  { %4417 = vmatpush1.bf16.msra.mxu0 %v6185_v19  ;;  %v6222_v19 = vld [vmem:[#allocation7 + $0x31c] ss:$12 sps:$4 sm:$0xff]  }
 0x1a1   :  { %4418 = vmatprep.subr.bf16.mxu0 %v6192_v22  ;;  %v6224_v22 = vld [vmem:[#allocation7 + $0x260] ss:$12 sps:$4 sm:$0xff]  }
 0x1a2   :  { %2342 = vmatpush1.bf16.msra.mxu1 %v6143_v18  ;;  %v6215_v18 = vld [vmem:[#allocation7 + $0x300] ss:$12 sps:$4 sm:$0xff]  }
 0x1a3   :  { %2343 = vmatprep.subr.bf16.mxu1 %v6151_v21  ;;  %v6223_v21 = vld [vmem:[#allocation7 + $0x188] ss:$12 sps:$4 sm:$0xff]  }
 0x1a4   :  { %4419 = vmatpush1.bf16.msra.mxu0 %v6190_v24  ;;  %v6227_v24 = vld [vmem:[#allocation7 + $0x334] ss:$12 sps:$4 sm:$0xff]  }
 0x1a5   :  { %4420 = vmatprep.subr.bf16.mxu0 %v6197_v25  ;;  %v6229_v25 = vld [vmem:[#allocation7 + $0x278] ss:$12 sps:$4 sm:$0xff]  }
 0x1a6   :  { %2344 = vmatpush1.bf16.msra.mxu1 %v6149_v23  ;;  %v6220_v23 = vld [vmem:[#allocation7 + $0x318] ss:$12 sps:$4 sm:$0xff]  }
 0x1a7   :  { %2345 = vmatprep.subr.bf16.mxu1 %v6157_v61  ;;  %v6228_v61 = vld [vmem:[#allocation7 + $0x1a0] ss:$12 sps:$4 sm:$0xff]  }
 0x1a8   :  { %4421 = vmatpush1.bf16.msra.mxu0 %v6195_v3  ;;  %v6225_v3 = vld [vmem:[#allocation7 + $0x330] ss:$12 sps:$4 sm:$0xff]  }
 0x1a9   :  { %4422 = vmatprep.subr.bf16.mxu0 %v6202_v28  ;;  %v6233_v28 = vld [vmem:[#allocation7 + $0x1b8] ss:$12 sps:$4 sm:$0xff]  }
 0x1aa   :  { %2346 = vmatpush1.bf16.msra.mxu1 %v6155_v26  ;;  %v6742_v26 = vld [vmem:[%s6801_s2 + $0x8] sm:$0xf] }
 0x1ab   :  { %2347 = vmatprep.subr.bf16.mxu1 %v6163_v27  ;;  %v6232_v27 = vld [vmem:[#allocation7 + $0x34c] ss:$12 sps:$4 sm:$0xff]  }
 0x1ac   :  { %4423 = vmatpush1.bf16.msra.mxu0 %v6200_v30  ;;  %v403_v30 = vrot.slane %v6742_v26, %v6701_v54 }
 0x1ad   :  { %4424 = vmatprep.subr.bf16.mxu0 %v6207_v32  ;;  %v6237_v32 = vld [vmem:[#allocation7 + $0x364] ss:$12 sps:$4 sm:$0xff]  }
 0x1ae   :  { %2348 = vmatpush1.bf16.msra.mxu1 %v6161_v29  ;;  %v6234_v29 = vld [vmem:[#allocation7 + $0x290] ss:$12 sps:$4 sm:$0xff]  }
 0x1af   :  { %2349 = vmatprep.subr.bf16.mxu1 %v6169_v31  ;;  %v6230_v31 = vld [vmem:[#allocation7 + $0x348] ss:$12 sps:$4 sm:$0xff]  }
 0x1b0   :  { %4425 = vmatpush1.bf16.msra.mxu0 %v6205_v33 }
 0x1b1   :  { %4426 = vmatprep.subr.bf16.mxu0 %v6212_v36 }
 0x1b2   :  { %2350 = vmatpush1.bf16.msra.mxu1 %v6167_v35  ;;  %v6238_v35 = vld [vmem:[#allocation7 + $0x1d0] ss:$12 sps:$4 sm:$0xff]  }
 0x1b3   :  { %2351 = vmatprep.subr.bf16.mxu1 %v6175_v37 }
 0x1b4   :  { %4427 = vmatpush1.bf16.msra.mxu0 %v6210_v38  ;;  %v6239_v38 = vld [vmem:[#allocation7 + $0x2a8] ss:$12 sps:$4 sm:$0xff]  }
 0x1b5   :  { %4439 = vmatprep.subr.bf16.mxu0 %v6217_v40 }
 0x1b6   :  { %2352 = vmatpush1.bf16.msra.mxu1 %v6173_v39 }
 0x1b7   :  { %5457 = vmatprep.subr.bf16.mxu1 %v6179_v41  ;;  %v6235_v41 = vld [vmem:[#allocation7 + $0x360] ss:$12 sps:$4 sm:$0xff]  }
 0x1b9   :  { %2370 = vmatmul.mubr.bf16.vlgmr.msra.gmra.mrb[12].mxu1 %v6673_v34  ;;  %v378_v34 = vsub.s32 3, %v6690_v49 }
 0x1ba   :  { %5458 = vmatpush3.bf16.msra.mxu1 %v6183_v42  ;;  %4643 = vmatprep.mubr.bf16.mxu1 %v6709_v14  ;;  %v6204_v14 = vld [vmem:[#allocation7 + $0x140] ss:$12 sps:$4 sm:$0xff]  }
 0x1bb   :  { %5459 = vmatprep.subr.bf16.mxu1 %v6184_v43  ;;  %v379_v56 = vrot.slane %v6695_v52, %v378_v34  ;;  %v6218_v52 = vld [vmem:[#allocation7 + $0xb0] ss:$12 sps:$4 sm:$0xff]  }
 0x1be   :  { %5460 = vmatpush3.bf16.msra.mxu1 %v6188_v44 }
 0x1bf   :  { %5461 = vmatprep.subr.bf16.mxu1 %v6189_v45  ;;  %v6242_v45 = vld [vmem:[#allocation7 + $0x37c] ss:$12 sps:$4 sm:$0xff]  }
 0x1c2   :  { %5462 = vmatpush3.bf16.msra.mxu1 %v6193_v46 }
 0x1c3   :  { %5463 = vmatprep.subr.bf16.mxu1 %v6194_v47 }
 0x1c6   :  { %5464 = vmatpush3.bf16.msra.mxu1 %v6198_v48  ;;  %v6243_v48 = vld [vmem:[#allocation7 + $0x1e8] ss:$12 sps:$4 sm:$0xff]  }
 0x1c7   :  { %5465 = vmatprep.subr.bf16.mxu1 %v6199_v50 }
 0x1ca   :  { %5466 = vmatpush3.bf16.msra.mxu1 %v6203_v53  ;;  %v6244_v53 = vld [vmem:[#allocation7 + $0x2c0] ss:$12 sps:$4 sm:$0xff]  }
 0x1cb   :  { %5467 = vmatprep.subr.bf16.mxu1 %v6204_v14 }
 0x1cc   :  { %v2027_v62 = vpop.f32.mrb[4].mxu1 }
 0x1cd   :  { %v5593_v63 = vadd.f32 %v2027_v62, %v375_v55  ;;  %v2029_v0 = vpop.f32.mrb[5].mxu1  ;;  %v6248_v62 = vld [vmem:[#allocation7 + $0x200] ss:$12 sps:$4 sm:$0xff]  }
 0x1ce   :  { %v5594_v1 = vadd.f32 %v2029_v0, %v379_v56  ;;  %v2031_v2 = vpop.f32.mrb[6].mxu1  ;;  %5468 = vmatpush3.bf16.msra.mxu1 %v6208_v58  ;;  %v6247_v58 = vld [vmem:[#allocation7 + $0x394] ss:$12 sps:$4 sm:$0xff]   ;;  %v6245_v0 = vld [vmem:[#allocation7 + $0x390] ss:$12 sps:$4 sm:$0xff]  }
 0x1cf   :  { %v5595_v5 = vadd.f32 %v2031_v2, %v375_v55  ;;  %v2033_v6 = vpop.f32.mrb[7].mxu1  ;;  %5469 = vmatprep.subr.bf16.mxu1 %v6209_v59  ;;  %v2382_v9 = vmax.f32 %v5593_v63, 0.0  ;;  %v6240_v55 = vld [vmem:[#allocation7 + $0x378] ss:$12 sps:$4 sm:$0xff]  }
 0x1d0   :  { %v5596_v8 = vadd.f32 %v2033_v6, %v379_v56  ;;  %v2383_v11 = vmax.f32 %v5594_v1, 0.0  ;;  %v6249_v63 = vld [vmem:[#allocation7 + $0x2d8] ss:$12 sps:$4 sm:$0xff]  }
 0x1d1   :  { %v2394_v10 = vmax.f32 %v5595_v5, 0.0  ;;  %v6252_v1 = vld [vmem:[#allocation7 + $0x3ac] ss:$12 sps:$4 sm:$0xff]   ;;  %v6250_v5 = vld [vmem:[#allocation7 + $0x3a8] ss:$12 sps:$4 sm:$0xff]  }
 0x1d2   :  { %v2395_v12 = vmax.f32 %v5596_v8, 0.0  ;;  %5470 = vmatpush3.bf16.msra.mxu1 %v6213_v4  ;;  %v6253_v2 = vld [vmem:[#allocation7 + $0x218] ss:$12 sps:$4 sm:$0xff]   ;;  %v6254_v4 = vld [vmem:[#allocation7 + $0x2f0] ss:$12 sps:$4 sm:$0xff]  }
 0x1d3   :  { %v6734_v15 = vpack.c.bf16 %v2394_v10, %v2382_v9  ;;  %5471 = vmatprep.subr.bf16.mxu1 %v6214_v7  ;;  %v2285_v33 = vpop.f32.mrb[4].mxu0  ;;  %v6257_v6 = vld [vmem:[#allocation7 + $0x3c4] ss:$12 sps:$4 sm:$0xff]   ;;  %v6259_v8 = vld [vmem:[#allocation7 + $0x3c8] ss:$12 sps:$4 sm:$0xff]  }
 0x1d4   :  { %v2407_v17 = vpack.c.bf16 %v2395_v12, %v2383_v11  ;;  %v2287_v37 = vpop.f32.mrb[5].mxu0  ;;  %v6258_v7 = vld [vmem:[#allocation7 + $0x230] ss:$12 sps:$4 sm:$0xff]   ;;  %v6255_v9 = vld [vmem:[#allocation7 + $0x3c0] ss:$12 sps:$4 sm:$0xff]  }
 0x1d5   :  { %v5606_v39 = vadd.f32 %v2287_v37, %v403_v30  ;;  %v2289_v40 = vpop.f32.mrb[6].mxu0  ;;  %v6262_v10 = vld [vmem:[#allocation7 + $0x3dc] ss:$12 sps:$4 sm:$0xff]   ;;  %v6264_v12 = vld [vmem:[#allocation7 + $0x3e0] ss:$12 sps:$4 sm:$0xff]  }
 0x1d6   :  { %4428 = vmatprep.mubr.bf16.mxu0 %v2407_v17  ;;  %5472 = vmatpush3.bf16.msra.mxu1 %v6218_v52  ;;  %v2291_v44 = vpop.f32.mrb[7].mxu0  ;;  %v6263_v11 = vld [vmem:[#allocation7 + $0x308] ss:$12 sps:$4 sm:$0xff]   ;;  %v6260_v52 = vld [vmem:[#allocation7 + $0x3d8] ss:$12 sps:$4 sm:$0xff]  }
 0x1d7   :  { %4429 = vmatmul.mubr.bf16.vlgmr.msra.gmra.mrb[8].mxu0 %v6734_v15  ;;  %5479 = vmatprep.subr.bf16.mxu1 %v6219_v16  ;;  %v2389_v46 = vmax.f32 %v5606_v39, 0.0  ;;  %v5608_v47 = vadd.f32 %v2291_v44, %v403_v30  ;;  %v6267_v16 = vld [vmem:[#allocation7 + $0x3f4] ss:$12 sps:$4 sm:$0xff]   ;;  %v6298_v39 = vld [vmem:[#allocation7 + $0x3b0] ss:$12 sps:$4 sm:$0xff]  }
 0x1d8   :  { %4440 = vmatpush1.bf16.msra.mxu0 %v6215_v18  ;;  %4471 = vmatprep.mubr.bf16.mxu0 %v6719_v60  ;;  %v6269_v18 = vld [vmem:[#allocation7 + $0x3f8] ss:$12 sps:$4 sm:$0xff]   ;;  %v6288_v30 = vld [vmem:[#allocation7 + $0x380] ss:$12 sps:$4 sm:$0xff]   ;;  %v6290_v37 = vld [vmem:[#allocation7 + $0x468] ss:$12 sps:$4 sm:$0xff]  }
 0x1d9   :  { %4644 = vmatmul.mubr.bf16.vlgmr.msra.gmra.mrb[16].mxu1 %v6707_v13  ;;  %4441 = vmatprep.subr.bf16.mxu0 %v6222_v19  ;;  %v399_v13 = vrot.slane %v6742_v26, %v6698_v20  ;;  %v2401_v14 = vmax.f32 %v5608_v47, 0.0  ;;  %v6265_v19 = vld [vmem:[#allocation7 + $0x3f0] ss:$12 sps:$4 sm:$0xff]   ;;  %v6304_v44 = vld [vmem:[#allocation7 + $0x560] ss:$12 sps:$4 sm:$0xff]  }
 0x1da   :  { %5480 = vmatpush3.bf16.msra.mxu1 %v6223_v21  ;;  %4684 = vmatprep.mubr.bf16.mxu1 %v2407_v17  ;;  %v6268_v17 = vld [vmem:[#allocation7 + $0x320] ss:$12 sps:$4 sm:$0xff]  }
 0x1db   :  { %5481 = vmatprep.subr.bf16.mxu1 %v6224_v22  ;;  %v5605_v36 = vadd.f32 %v2285_v33, %v399_v13  ;;  %v5607_v43 = vadd.f32 %v2289_v40, %v399_v13  ;;  %v6750_v59 = vpack.c.bf16 %v2401_v14, %v2389_v46  ;;  %v6272_v21 = vld [vmem:[#allocation7 + $0x40c] ss:$12 sps:$4 sm:$0xff]   ;;  %v6299_v40 = vld [vmem:[#allocation7 + $0x548] ss:$12 sps:$4 sm:$0xff]  }
 0x1dc   :  { %4442 = vmatpush1.bf16.msra.mxu0 %v6220_v23  ;;  %v6273_v22 = vld [vmem:[#allocation7 + $0x338] ss:$12 sps:$4 sm:$0xff]   ;;  %v6274_v23 = vld [vmem:[#allocation7 + $0x410] ss:$12 sps:$4 sm:$0xff]   ;;  %v6307_v46 = vld [vmem:[#allocation7 + $0x4b4] ss:$12 sps:$4 sm:$0xff]  }
 0x1dd   :  { %4443 = vmatprep.subr.bf16.mxu0 %v6227_v24  ;;  %v2388_v42 = vmax.f32 %v5605_v36, 0.0  ;;  %v2400_v50 = vmax.f32 %v5607_v43, 0.0  ;;  %v6270_v24 = vld [vmem:[#allocation7 + $0x408] ss:$12 sps:$4 sm:$0xff]   ;;  %v6280_v13 = vld [vmem:[#allocation7 + $0x438] ss:$12 sps:$4 sm:$0xff]  }
 0x1de   :  { %5482 = vmatpush3.bf16.msra.mxu1 %v6228_v61  ;;  %v6278_v61 = vld [vmem:[#allocation7 + $0x350] ss:$12 sps:$4 sm:$0xff]   ;;  %v6292_v33 = vld [vmem:[#allocation7 + $0x46c] ss:$12 sps:$4 sm:$0xff]   ;;  %v6303_v43 = vld [vmem:[#allocation7 + $0x488] ss:$12 sps:$4 sm:$0xff]  }
 0x1df   :  { %5483 = vmatprep.subr.bf16.mxu1 %v6229_v25  ;;  %v6748_v56 = vpack.c.bf16 %v2400_v50, %v2388_v42  ;;  %v6279_v25 = vld [vmem:[#allocation7 + $0x428] ss:$12 sps:$4 sm:$0xff]   ;;  %v6294_v36 = vld [vmem:[#allocation7 + $0x470] ss:$12 sps:$4 sm:$0xff]   ;;  %v6308_v47 = vld [vmem:[#allocation7 + $0x4a0] ss:$12 sps:$4 sm:$0xff]  }
 0x1e0   :  { %4444 = vmatpush1.bf16.msra.mxu0 %v6225_v3  ;;  %v6282_v3 = vld [vmem:[#allocation7 + $0x43c] ss:$12 sps:$4 sm:$0xff]   ;;  %v6313_v14 = vld [vmem:[#allocation7 + $0x4b8] ss:$12 sps:$4 sm:$0xff]  }
 0x1e1   :  { %4445 = vmatprep.subr.bf16.mxu0 %v6232_v27  ;;  %v6283_v27 = vld [vmem:[#allocation7 + $0x368] ss:$12 sps:$4 sm:$0xff]   ;;  %v6305_v50 = vld [vmem:[#allocation7 + $0x4b0] ss:$12 sps:$4 sm:$0xff]  }
 0x1e2   :  { %5484 = vmatpush3.bf16.msra.mxu1 %v6233_v28  ;;  %v6284_v28 = vld [vmem:[#allocation7 + $0x440] ss:$12 sps:$4 sm:$0xff]   ;;  %v6302_v42 = vld [vmem:[#allocation7 + $0x49c] ss:$12 sps:$4 sm:$0xff]  }
 0x1e3   :  { %5485 = vmatprep.subr.bf16.mxu1 %v6234_v29  ;;  %v6287_v29 = vld [vmem:[#allocation7 + $0x454] ss:$12 sps:$4 sm:$0xff]  }
 0x1e4   :  { %4446 = vmatpush1.bf16.msra.mxu0 %v6230_v31  ;;  %v6289_v31 = vld [vmem:[#allocation7 + $0x458] ss:$12 sps:$4 sm:$0xff]  }
 0x1e5   :  { %4447 = vmatprep.subr.bf16.mxu0 %v6237_v32  ;;  %v6285_v32 = vld [vmem:[#allocation7 + $0x450] ss:$12 sps:$4 sm:$0xff]  }
 0x1e6   :  { %5486 = vmatpush3.bf16.msra.mxu1 %v6238_v35  ;;  %v6293_v35 = vld [vmem:[#allocation7 + $0x398] ss:$12 sps:$4 sm:$0xff]  }
 0x1e7   :  { %5487 = vmatprep.subr.bf16.mxu1 %v6239_v38  ;;  %v6297_v38 = vld [vmem:[#allocation7 + $0x484] ss:$12 sps:$4 sm:$0xff]  }
 0x1e8   :  { %4448 = vmatpush1.bf16.msra.mxu0 %v6235_v41  ;;  %v6295_v41 = vld [vmem:[#allocation7 + $0x480] ss:$12 sps:$4 sm:$0xff]  }
 0x1e9   :  { %4449 = vmatprep.subr.bf16.mxu0 %v6242_v45  ;;  %v6300_v45 = vld [vmem:[#allocation7 + $0x498] ss:$12 sps:$4 sm:$0xff]  }
 0x1ea   :  { %5488 = vmatpush3.bf16.msra.mxu1 %v6243_v48  ;;  %v6309_v48 = vld [vmem:[#allocation7 + $0x578] ss:$12 sps:$4 sm:$0xff]  }
 0x1eb   :  { %5489 = vmatprep.subr.bf16.mxu1 %v6244_v53  ;;  %v6312_v53 = vld [vmem:[#allocation7 + $0x4cc] ss:$12 sps:$4 sm:$0xff]  }
 0x1ec   :  { %4450 = vmatpush1.bf16.msra.mxu0 %v6240_v55  ;;  %v6314_v55 = vld [vmem:[#allocation7 + $0x590] ss:$12 sps:$4 sm:$0xff]  }
 0x1ed   :  { %4451 = vmatprep.subr.bf16.mxu0 %v6247_v58  ;;  %v6310_v58 = vld [vmem:[#allocation7 + $0x4c8] ss:$12 sps:$4 sm:$0xff]  }
 0x1ee   :  { %5490 = vmatpush3.bf16.msra.mxu1 %v6248_v62  ;;  %v6317_v62 = vld [vmem:[#allocation7 + $0x4e4] ss:$12 sps:$4 sm:$0xff]  }
 0x1ef   :  { %5491 = vmatprep.subr.bf16.mxu1 %v6249_v63  ;;  %v6319_v63 = vld [vmem:[#allocation7 + $0x5a8] ss:$12 sps:$4 sm:$0xff]  }
 0x1f0   :  { %4452 = vmatpush1.bf16.msra.mxu0 %v6245_v0  ;;  %v6315_v0 = vld [vmem:[#allocation7 + $0x4e0] ss:$12 sps:$4 sm:$0xff]  }
 0x1f1   :  { %4453 = vmatprep.subr.bf16.mxu0 %v6252_v1  ;;  %v6322_v1 = vld [vmem:[#allocation7 + $0x4fc] ss:$12 sps:$4 sm:$0xff]  }
 0x1f2   :  { %5492 = vmatpush3.bf16.msra.mxu1 %v6253_v2  ;;  %v390_v2 = vsub.s32 6, %v6690_v49 }
 0x1f3   :  { %5493 = vmatprep.subr.bf16.mxu1 %v6254_v4  ;;  %v6323_v4 = vld [vmem:[#allocation7 + $0x4e8] ss:$12 sps:$4 sm:$0xff]  }
 0x1f4   :  { %4454 = vmatpush1.bf16.msra.mxu0 %v6250_v5  ;;  %v394_v5 = vsub.s32 7, %v6690_v49  ;;  %v6442_v49 = vld [vmem:[#allocation7 + $0x784] ss:$12 sps:$4 sm:$0xff]  }
 0x1f5   :  { %4455 = vmatprep.subr.bf16.mxu0 %v6257_v6  ;;  %v6324_v6 = vld [vmem:[#allocation7 + $0x5c0] ss:$12 sps:$4 sm:$0xff]  }
 0x1f6   :  { %5494 = vmatpush3.bf16.msra.mxu1 %v6258_v7  ;;  %v6320_v7 = vld [vmem:[#allocation7 + $0x4f8] ss:$12 sps:$4 sm:$0xff]  }
 0x1f7   :  { %5501 = vmatprep.subr.bf16.mxu1 %v6259_v8  ;;  %v6488_v8 = vld [vmem:[%s6801_s2] sm:$0xff] }
 0x1f8   :  { %4456 = vmatpush1.bf16.msra.mxu0 %v6255_v9  ;;  %v391_v9 = vrot.slane %v6488_v8, %v390_v2  ;;  %v6369_v2 = vld [vmem:[#allocation7 + $0x758] ss:$12 sps:$4 sm:$0xff]  }
 0x1f9   :  { %4685 = vmatmul.mubr.bf16.vlgmr.msra.gmra.mrb[20].mxu1 %v6734_v15  ;;  %4457 = vmatprep.subr.bf16.mxu0 %v6262_v10  ;;  %v6277_v15 = vld [vmem:[#allocation7 + $0x424] ss:$12 sps:$4 sm:$0xff]   ;;  %v6327_v10 = vld [vmem:[#allocation7 + $0x514] ss:$12 sps:$4 sm:$0xff]  }
 0x1fa   :  { %5502 = vmatpush3.bf16.msra.mxu1 %v6263_v11  ;;  %4725 = vmatprep.mubr.bf16.mxu1 %v6719_v60  ;;  %v6275_v60 = vld [vmem:[#allocation7 + $0x420] ss:$12 sps:$4 sm:$0xff]   ;;  %v395_v11 = vrot.slane %v6488_v8, %v394_v5  ;;  %v6370_v8 = vld [vmem:[#allocation7 + $0x5e8] ss:$12 sps:$4 sm:$0xff]  }
 0x1fb   :  { %5503 = vmatprep.subr.bf16.mxu1 %v6264_v12  ;;  %v6328_v12 = vld [vmem:[#allocation7 + $0x500] ss:$12 sps:$4 sm:$0xff]  }
 0x1fc   :  { %4458 = vmatpush1.bf16.msra.mxu0 %v6260_v52  ;;  %v6329_v52 = vld [vmem:[#allocation7 + $0x5d8] ss:$12 sps:$4 sm:$0xff]  }
 0x1fd   :  { %4459 = vmatprep.subr.bf16.mxu0 %v6267_v16  ;;  %v6372_v5 = vld [vmem:[#allocation7 + $0x5ec] ss:$12 sps:$4 sm:$0xff]  }
 0x1fe   :  { %5504 = vmatpush3.bf16.msra.mxu1 %v6268_v17  ;;  %v6325_v17 = vld [vmem:[#allocation7 + $0x510] ss:$12 sps:$4 sm:$0xff]  }
 0x1ff   :  { %5505 = vmatprep.subr.bf16.mxu1 %v6269_v18 }
 0x200   :  { %4460 = vmatpush1.bf16.msra.mxu0 %v6265_v19 }
 0x201   :  { %4461 = vmatprep.subr.bf16.mxu0 %v6272_v21  ;;  %v6332_v21 = vld [vmem:[#allocation7 + $0x52c] ss:$12 sps:$4 sm:$0xff]  }
 0x202   :  { %5506 = vmatpush3.bf16.msra.mxu1 %v6273_v22 }
 0x203   :  { %5507 = vmatprep.subr.bf16.mxu1 %v6274_v23 }
 0x204   :  { %4462 = vmatpush1.bf16.msra.mxu0 %v6270_v24  ;;  %v6333_v24 = vld [vmem:[#allocation7 + $0x518] ss:$12 sps:$4 sm:$0xff]  }
 0x205   :  { %4463 = vmatprep.subr.bf16.mxu0 %v6277_v15 }
 0x206   :  { %5508 = vmatpush3.bf16.msra.mxu1 %v6278_v61 }
 0x207   :  { %5509 = vmatprep.subr.bf16.mxu1 %v6279_v25 }
 0x208   :  { %4464 = vmatpush1.bf16.msra.mxu0 %v6275_v60  ;;  %v6334_v60 = vld [vmem:[#allocation7 + $0x5f0] ss:$12 sps:$4 sm:$0xff]  }
 0x209   :  { %4465 = vmatprep.subr.bf16.mxu0 %v6282_v3 }
 0x20a   :  { %5510 = vmatpush3.bf16.msra.mxu1 %v6283_v27  ;;  %v6330_v27 = vld [vmem:[#allocation7 + $0x528] ss:$12 sps:$4 sm:$0xff]  }
 0x20b   :  { %5511 = vmatprep.subr.bf16.mxu1 %v6284_v28 }
 0x20c   :  { %4466 = vmatpush1.bf16.msra.mxu0 %v6280_v13  ;;  %v6337_v13 = vld [vmem:[#allocation7 + $0x544] ss:$12 sps:$4 sm:$0xff]  }
 0x20d   :  { %4467 = vmatprep.subr.bf16.mxu0 %v6287_v29 }
 0x20e   :  { %5512 = vmatpush3.bf16.msra.mxu1 %v6288_v30 }
 0x20f   :  { %5513 = vmatprep.subr.bf16.mxu1 %v6289_v31  ;;  %v6338_v31 = vld [vmem:[#allocation7 + $0x530] ss:$12 sps:$4 sm:$0xff]  }
 0x210   :  { %4468 = vmatpush1.bf16.msra.mxu0 %v6285_v32 }
 0x211   :  { %4469 = vmatprep.subr.bf16.mxu0 %v6292_v33  ;;  %v6339_v33 = vld [vmem:[#allocation7 + $0x6c8] ss:$12 sps:$4 sm:$0xff]  }
 0x212   :  { %5514 = vmatpush3.bf16.msra.mxu1 %v6293_v35 }
 0x213   :  { %5515 = vmatprep.subr.bf16.mxu1 %v6294_v36  ;;  %v6335_v36 = vld [vmem:[#allocation7 + $0x540] ss:$12 sps:$4 sm:$0xff]  }
 0x214   :  { %4470 = vmatpush1.bf16.msra.mxu0 %v6290_v37  ;;  %v6342_v37 = vld [vmem:[#allocation7 + $0x55c] ss:$12 sps:$4 sm:$0xff]  }
 0x215   :  { %4482 = vmatprep.subr.bf16.mxu0 %v6297_v38  ;;  %v6343_v38 = vld [vmem:[#allocation7 + $0x608] ss:$12 sps:$4 sm:$0xff]  }
 0x216   :  { %5516 = vmatpush3.bf16.msra.mxu1 %v6298_v39  ;;  %v6344_v39 = vld [vmem:[#allocation7 + $0x6e0] ss:$12 sps:$4 sm:$0xff]  }
 0x217   :  { %4472 = vmatmul.mubr.bf16.vlgmr.msra.gmra.mrb[8].mxu0 %v6717_v57  ;;  %5523 = vmatprep.subr.bf16.mxu1 %v6299_v40  ;;  %v6340_v40 = vld [vmem:[#allocation7 + $0x558] ss:$12 sps:$4 sm:$0xff]  }
 0x218   :  { %4483 = vmatpush1.bf16.msra.mxu0 %v6295_v41  ;;  %v6347_v41 = vld [vmem:[#allocation7 + $0x574] ss:$12 sps:$4 sm:$0xff]  }
 0x219   :  { %4726 = vmatmul.mubr.bf16.vlgmr.msra.gmra.mrb[24].mxu1 %v6717_v57  ;;  %4484 = vmatprep.subr.bf16.mxu0 %v6302_v42  ;;  %v6318_v57 = vld [vmem:[#allocation7 + $0x4d0] ss:$12 sps:$4 sm:$0xff]   ;;  %v6348_v42 = vld [vmem:[#allocation7 + $0x620] ss:$12 sps:$4 sm:$0xff]  }
 0x21a   :  { %5524 = vmatpush3.bf16.msra.mxu1 %v6303_v43  ;;  %v6349_v43 = vld [vmem:[#allocation7 + $0x6f8] ss:$12 sps:$4 sm:$0xff]  }
 0x21b   :  { %5525 = vmatprep.subr.bf16.mxu1 %v6304_v44  ;;  %v6345_v44 = vld [vmem:[#allocation7 + $0x570] ss:$12 sps:$4 sm:$0xff]  }
 0x21c   :  { %4485 = vmatpush1.bf16.msra.mxu0 %v6300_v45  ;;  %v6352_v45 = vld [vmem:[#allocation7 + $0x58c] ss:$12 sps:$4 sm:$0xff]  }
 0x21d   :  { %4486 = vmatprep.subr.bf16.mxu0 %v6307_v46  ;;  %v6353_v46 = vld [vmem:[#allocation7 + $0x638] ss:$12 sps:$4 sm:$0xff]  }
 0x21e   :  { %5526 = vmatpush3.bf16.msra.mxu1 %v6308_v47  ;;  %v6354_v47 = vld [vmem:[#allocation7 + $0x710] ss:$12 sps:$4 sm:$0xff]  }
 0x21f   :  { %5527 = vmatprep.subr.bf16.mxu1 %v6309_v48  ;;  %v6350_v48 = vld [vmem:[#allocation7 + $0x588] ss:$12 sps:$4 sm:$0xff]  }
 0x220   :  { %4487 = vmatpush1.bf16.msra.mxu0 %v6305_v50  ;;  %v6357_v50 = vld [vmem:[#allocation7 + $0x5a4] ss:$12 sps:$4 sm:$0xff]  }
 0x221   :  { %4488 = vmatprep.subr.bf16.mxu0 %v6312_v53  ;;  %v6358_v53 = vld [vmem:[#allocation7 + $0x650] ss:$12 sps:$4 sm:$0xff]  }
 0x222   :  { %5528 = vmatpush3.bf16.msra.mxu1 %v6313_v14  ;;  %v6359_v14 = vld [vmem:[#allocation7 + $0x728] ss:$12 sps:$4 sm:$0xff]  }
 0x223   :  { %5529 = vmatprep.subr.bf16.mxu1 %v6314_v55  ;;  %v6355_v55 = vld [vmem:[#allocation7 + $0x5a0] ss:$12 sps:$4 sm:$0xff]  }
 0x224   :  { %4489 = vmatpush1.bf16.msra.mxu0 %v6310_v58  ;;  %v6362_v58 = vld [vmem:[#allocation7 + $0x5bc] ss:$12 sps:$4 sm:$0xff]  }
 0x225   :  { %4490 = vmatprep.subr.bf16.mxu0 %v6317_v62  ;;  %v6363_v62 = vld [vmem:[#allocation7 + $0x668] ss:$12 sps:$4 sm:$0xff]  }
 0x226   :  { %5530 = vmatpush3.bf16.msra.mxu1 %v6318_v57  ;;  %v6364_v57 = vld [vmem:[#allocation7 + $0x740] ss:$12 sps:$4 sm:$0xff]  }
 0x227   :  { %5531 = vmatprep.subr.bf16.mxu1 %v6319_v63  ;;  %v6360_v63 = vld [vmem:[#allocation7 + $0x5b8] ss:$12 sps:$4 sm:$0xff]  }
 0x228   :  { %4491 = vmatpush1.bf16.msra.mxu0 %v6315_v0  ;;  %v6367_v0 = vld [vmem:[#allocation7 + $0x5d4] ss:$12 sps:$4 sm:$0xff]  }
 0x229   :  { %4492 = vmatprep.subr.bf16.mxu0 %v6322_v1  ;;  %v6368_v1 = vld [vmem:[#allocation7 + $0x680] ss:$12 sps:$4 sm:$0xff]  }
 0x22a   :  { %5532 = vmatpush3.bf16.msra.mxu1 %v6323_v4  ;;  %v6365_v4 = vld [vmem:[#allocation7 + $0x5d0] ss:$12 sps:$4 sm:$0xff]  }
 0x22b   :  { %5533 = vmatprep.subr.bf16.mxu1 %v6324_v6  ;;  %v6373_v6 = vld [vmem:[#allocation7 + $0x698] ss:$12 sps:$4 sm:$0xff]  }
 0x22c   :  { %4493 = vmatpush1.bf16.msra.mxu0 %v6320_v7  ;;  %v2199_v16 = vpop.f32.mrb[8].mxu1  ;;  %v6374_v7 = vld [vmem:[#allocation7 + $0x770] ss:$12 sps:$4 sm:$0xff]  }
 0x22d   :  { %v5601_v18 = vadd.f32 %v2199_v16, %v391_v9  ;;  %v2201_v19 = vpop.f32.mrb[9].mxu1  ;;  %4494 = vmatprep.subr.bf16.mxu0 %v6327_v10  ;;  %v6378_v10 = vld [vmem:[#allocation7 + $0x6b0] ss:$12 sps:$4 sm:$0xff]   ;;  %v6404_v16 = vld [vmem:[#allocation7 + $0x788] ss:$12 sps:$4 sm:$0xff]  }
 0x22e   :  { %v5602_v22 = vadd.f32 %v2201_v19, %v395_v11  ;;  %v2203_v23 = vpop.f32.mrb[10].mxu1  ;;  %5534 = vmatpush3.bf16.msra.mxu1 %v6328_v12  ;;  %v6375_v12 = vld [vmem:[#allocation7 + $0x600] ss:$12 sps:$4 sm:$0xff]  }
 0x22f   :  { %v2386_v15 = vmax.f32 %v5601_v18, 0.0  ;;  %v5603_v61 = vadd.f32 %v2203_v23, %v391_v9  ;;  %v2205_v25 = vpop.f32.mrb[11].mxu1  ;;  %5535 = vmatprep.subr.bf16.mxu1 %v6329_v52  ;;  %v6377_v9 = vld [vmem:[#allocation7 + $0x604] ss:$12 sps:$4 sm:$0xff]   ;;  %v6381_v52 = vld [vmem:[#allocation7 + $0x61c] ss:$12 sps:$4 sm:$0xff]  }
 0x230   :  { %v5604_v3 = vadd.f32 %v2205_v25, %v395_v11  ;;  %4495 = vmatpush1.bf16.msra.mxu0 %v6325_v17  ;;  %v2387_v29 = vmax.f32 %v5602_v22, 0.0  ;;  %v6403_v11 = vld [vmem:[#allocation7 + $0x848] ss:$12 sps:$4 sm:$0xff]   ;;  %v6408_v17 = vld [vmem:[#allocation7 + $0x860] ss:$12 sps:$4 sm:$0xff]  }
 0x231   :  { %v2398_v28 = vmax.f32 %v5603_v61, 0.0  ;;  %4496 = vmatprep.subr.bf16.mxu0 %v6332_v21  ;;  %v6379_v18 = vld [vmem:[#allocation7 + $0x618] ss:$12 sps:$4 sm:$0xff]   ;;  %v6384_v19 = vld [vmem:[#allocation7 + $0x634] ss:$12 sps:$4 sm:$0xff]  }
 0x232   :  { %v2399_v30 = vmax.f32 %v5604_v3, 0.0  ;;  %5536 = vmatpush3.bf16.msra.mxu1 %v6333_v24  ;;  %v6409_v21 = vld [vmem:[#allocation7 + $0x7a0] ss:$12 sps:$4 sm:$0xff]   ;;  %v6413_v22 = vld [vmem:[#allocation7 + $0x878] ss:$12 sps:$4 sm:$0xff]  }
 0x233   :  { %v6761_v32 = vpack.c.bf16 %v2398_v28, %v2386_v15  ;;  %5537 = vmatprep.subr.bf16.mxu1 %v6334_v60  ;;  %v6382_v23 = vld [vmem:[#allocation7 + $0x630] ss:$12 sps:$4 sm:$0xff]   ;;  %v6387_v24 = vld [vmem:[#allocation7 + $0x64c] ss:$12 sps:$4 sm:$0xff]   ;;  %v6385_v25 = vld [vmem:[#allocation7 + $0x648] ss:$12 sps:$4 sm:$0xff]  }
 0x234   :  { %v2411_v35 = vpack.c.bf16 %v2399_v30, %v2387_v29  ;;  %4497 = vmatpush1.bf16.msra.mxu0 %v6330_v27  ;;  %v6414_v15 = vld [vmem:[#allocation7 + $0x7b8] ss:$12 sps:$4 sm:$0xff]   ;;  %v6418_v61 = vld [vmem:[#allocation7 + $0x890] ss:$12 sps:$4 sm:$0xff]   ;;  %v6423_v3 = vld [vmem:[#allocation7 + $0x8a8] ss:$12 sps:$4 sm:$0xff]  }
 0x235   :  { %4498 = vmatprep.subr.bf16.mxu0 %v6337_v13  ;;  %v6419_v60 = vld [vmem:[#allocation7 + $0x7d0] ss:$12 sps:$4 sm:$0xff]   ;;  %v6388_v27 = vld [vmem:[#allocation7 + $0x660] ss:$12 sps:$4 sm:$0xff]   ;;  %v6424_v13 = vld [vmem:[#allocation7 + $0x7e8] ss:$12 sps:$4 sm:$0xff]  }
 0x236   :  { %4514 = vmatprep.mubr.bf16.mxu0 %v2411_v35  ;;  %5538 = vmatpush3.bf16.msra.mxu1 %v6338_v31  ;;  %v6393_v28 = vld [vmem:[#allocation7 + $0x67c] ss:$12 sps:$4 sm:$0xff]   ;;  %v6428_v29 = vld [vmem:[#allocation7 + $0x8c0] ss:$12 sps:$4 sm:$0xff]   ;;  %v6391_v30 = vld [vmem:[#allocation7 + $0x678] ss:$12 sps:$4 sm:$0xff]  }
 0x237   :  { %4766 = vmatprep.mubr.bf16.mxu1 %v2411_v35  ;;  %5545 = vmatprep.subr.bf16.mxu1 %v6339_v33  ;;  %v6396_v31 = vld [vmem:[#allocation7 + $0x694] ss:$12 sps:$4 sm:$0xff]   ;;  %v6433_v33 = vld [vmem:[#allocation7 + $0x8d8] ss:$12 sps:$4 sm:$0xff]   ;;  %v6394_v35 = vld [vmem:[#allocation7 + $0x690] ss:$12 sps:$4 sm:$0xff]  }
 0x238   :  { %4499 = vmatpush1.bf16.msra.mxu0 %v6335_v36  ;;  %v6399_v36 = vld [vmem:[#allocation7 + $0x6ac] ss:$12 sps:$4 sm:$0xff]  }
 0x239   :  { %4767 = vmatmul.mubr.bf16.vlgmr.msra.gmra.mrb[28].mxu1 %v6761_v32  ;;  %4500 = vmatprep.subr.bf16.mxu0 %v6342_v37  ;;  %v6434_v37 = vld [vmem:[#allocation7 + $0x818] ss:$12 sps:$4 sm:$0xff]  }
 0x23a   :  { %5546 = vmatpush3.bf16.msra.mxu1 %v6343_v38  ;;  %4807 = vmatprep.mubr.bf16.mxu1 %v6750_v59  ;;  %v6438_v38 = vld [vmem:[#allocation7 + $0x8f0] ss:$12 sps:$4 sm:$0xff]  }
 0x23b   :  { %5547 = vmatprep.subr.bf16.mxu1 %v6344_v39  ;;  %v6397_v39 = vld [vmem:[#allocation7 + $0x6a8] ss:$12 sps:$4 sm:$0xff]  }
 0x23c   :  { %4501 = vmatpush1.bf16.msra.mxu0 %v6340_v40  ;;  %v6402_v40 = vld [vmem:[#allocation7 + $0x6c4] ss:$12 sps:$4 sm:$0xff]  }
 0x23d   :  { %4502 = vmatprep.subr.bf16.mxu0 %v6347_v41  ;;  %v6439_v41 = vld [vmem:[#allocation7 + $0x830] ss:$12 sps:$4 sm:$0xff]  }
 0x23e   :  { %5548 = vmatpush3.bf16.msra.mxu1 %v6348_v42  ;;  %v6400_v42 = vld [vmem:[#allocation7 + $0x6c0] ss:$12 sps:$4 sm:$0xff]  }
 0x23f   :  { %5549 = vmatprep.subr.bf16.mxu1 %v6349_v43  ;;  %v6407_v43 = vld [vmem:[#allocation7 + $0x6dc] ss:$12 sps:$4 sm:$0xff]  }
 0x240   :  { %4503 = vmatpush1.bf16.msra.mxu0 %v6345_v44  ;;  %v6405_v44 = vld [vmem:[#allocation7 + $0x6d8] ss:$12 sps:$4 sm:$0xff]  }
 0x241   :  { %4504 = vmatprep.subr.bf16.mxu0 %v6352_v45  ;;  %v6412_v45 = vld [vmem:[#allocation7 + $0x6f4] ss:$12 sps:$4 sm:$0xff]  }
 0x242   :  { %5550 = vmatpush3.bf16.msra.mxu1 %v6353_v46  ;;  %v6410_v46 = vld [vmem:[#allocation7 + $0x6f0] ss:$12 sps:$4 sm:$0xff]  }
 0x243   :  { %5551 = vmatprep.subr.bf16.mxu1 %v6354_v47  ;;  %v6417_v47 = vld [vmem:[#allocation7 + $0x70c] ss:$12 sps:$4 sm:$0xff]  }
 0x244   :  { %4505 = vmatpush1.bf16.msra.mxu0 %v6350_v48  ;;  %v6415_v48 = vld [vmem:[#allocation7 + $0x708] ss:$12 sps:$4 sm:$0xff]  }
 0x245   :  { %4506 = vmatprep.subr.bf16.mxu0 %v6357_v50  ;;  %v6422_v50 = vld [vmem:[#allocation7 + $0x724] ss:$12 sps:$4 sm:$0xff]  }
 0x246   :  { %5552 = vmatpush3.bf16.msra.mxu1 %v6358_v53  ;;  %v6420_v53 = vld [vmem:[#allocation7 + $0x720] ss:$12 sps:$4 sm:$0xff]  }
 0x247   :  { %5553 = vmatprep.subr.bf16.mxu1 %v6359_v14  ;;  %v6427_v14 = vld [vmem:[#allocation7 + $0x73c] ss:$12 sps:$4 sm:$0xff]  }
 0x248   :  { %4507 = vmatpush1.bf16.msra.mxu0 %v6355_v55  ;;  %v6425_v55 = vld [vmem:[#allocation7 + $0x738] ss:$12 sps:$4 sm:$0xff]  }
 0x249   :  { %4508 = vmatprep.subr.bf16.mxu0 %v6362_v58  ;;  %v407_v58 = vrot.slane %v6742_v26, %v6726_v51 }
 0x24a   :  { %5554 = vmatpush3.bf16.msra.mxu1 %v6363_v62  ;;  %v6432_v62 = vld [vmem:[#allocation7 + $0x754] ss:$12 sps:$4 sm:$0xff]  }
 0x24b   :  { %5555 = vmatprep.subr.bf16.mxu1 %v6364_v57  ;;  %v411_v57 = vrot.slane %v6742_v26, %v378_v34 }
 0x24c   :  { %4509 = vmatpush1.bf16.msra.mxu0 %v6360_v63 }
 0x24d   :  { %4510 = vmatprep.subr.bf16.mxu0 %v6367_v0  ;;  %v6430_v0 = vld [vmem:[#allocation7 + $0x750] ss:$12 sps:$4 sm:$0xff]  }
 0x24e   :  { %5556 = vmatpush3.bf16.msra.mxu1 %v6368_v1 }
 0x24f   :  { %5557 = vmatprep.subr.bf16.mxu1 %v6369_v2 }
 0x250   :  { %4511 = vmatpush1.bf16.msra.mxu0 %v6365_v4  ;;  %v6437_v4 = vld [vmem:[#allocation7 + $0x76c] ss:$12 sps:$4 sm:$0xff]  }
 0x251   :  { %4512 = vmatprep.subr.bf16.mxu0 %v6372_v5 }
 0x252   :  { %5558 = vmatpush3.bf16.msra.mxu1 %v6373_v6 }
 0x253   :  { %5559 = vmatprep.subr.bf16.mxu1 %v6374_v7 }
 0x254   :  { %4513 = vmatpush1.bf16.msra.mxu0 %v6370_v8 }
 0x255   :  { %4525 = vmatprep.subr.bf16.mxu0 %v6377_v9 }
 0x256   :  { %5560 = vmatpush3.bf16.msra.mxu1 %v6378_v10 }
 0x257   :  { %4515 = vmatmul.mubr.bf16.vlgmr.msra.gmra.mrb[8].mxu0 %v6761_v32  ;;  %5567 = vmatprep.subr.bf16.mxu1 %v6403_v11  ;;  %v6429_v32 = vld [vmem:[#allocation7 + $0x800] ss:$12 sps:$4 sm:$0xff]  }
 0x258   :  { %4526 = vmatpush1.bf16.msra.mxu0 %v6375_v12  ;;  %4557 = vmatprep.mubr.bf16.mxu0 %v6750_v59  ;;  %v6390_v59 = vld [vmem:[#allocation7 + $0x664] ss:$12 sps:$4 sm:$0xff]   ;;  %v6435_v12 = vld [vmem:[#allocation7 + $0x768] ss:$12 sps:$4 sm:$0xff]  }
 0x259   :  { %4808 = vmatmul.mubr.bf16.vlgmr.msra.gmra.mrb[32].mxu1 %v6748_v56  ;;  %4527 = vmatprep.subr.bf16.mxu0 %v6381_v52 }
 0x25a   :  { %5568 = vmatpush3.bf16.msra.mxu1 %v6404_v16 }
 0x25b   :  { %5569 = vmatprep.subr.bf16.mxu1 %v6408_v17  ;;  %v6440_v17 = vld [vmem:[#allocation7 + $0x780] ss:$12 sps:$4 sm:$0xff]  }
 0x25c   :  { %4528 = vmatpush1.bf16.msra.mxu0 %v6379_v18  ;;  %v6445_v18 = vld [vmem:[#allocation7 + $0x79c] ss:$12 sps:$4 sm:$0xff]  }
 0x25d   :  { %4529 = vmatprep.subr.bf16.mxu0 %v6384_v19  ;;  %v6443_v19 = vld [vmem:[#allocation7 + $0x798] ss:$12 sps:$4 sm:$0xff]  }
 0x25e   :  { %5570 = vmatpush3.bf16.msra.mxu1 %v6409_v21  ;;  %v6448_v21 = vld [vmem:[#allocation7 + $0x7b4] ss:$12 sps:$4 sm:$0xff]  }
 0x25f   :  { %5571 = vmatprep.subr.bf16.mxu1 %v6413_v22  ;;  %v6446_v22 = vld [vmem:[#allocation7 + $0x7b0] ss:$12 sps:$4 sm:$0xff]  }
 0x260   :  { %4530 = vmatpush1.bf16.msra.mxu0 %v6382_v23  ;;  %v6451_v23 = vld [vmem:[#allocation7 + $0x7cc] ss:$12 sps:$4 sm:$0xff]  }
 0x261   :  { %4531 = vmatprep.subr.bf16.mxu0 %v6387_v24  ;;  %v6449_v24 = vld [vmem:[#allocation7 + $0x7c8] ss:$12 sps:$4 sm:$0xff]  }
 0x262   :  { %5572 = vmatpush3.bf16.msra.mxu1 %v6414_v15  ;;  %v6454_v15 = vld [vmem:[#allocation7 + $0x7e4] ss:$12 sps:$4 sm:$0xff]  }
 0x263   :  { %5573 = vmatprep.subr.bf16.mxu1 %v6418_v61  ;;  %v6452_v61 = vld [vmem:[#allocation7 + $0x7e0] ss:$12 sps:$4 sm:$0xff]  }
 0x264   :  { %4532 = vmatpush1.bf16.msra.mxu0 %v6385_v25  ;;  %v6457_v25 = vld [vmem:[#allocation7 + $0x7fc] ss:$12 sps:$4 sm:$0xff]  }
 0x265   :  { %4533 = vmatprep.subr.bf16.mxu0 %v6390_v59  ;;  %v6460_v59 = vld [vmem:[#allocation7 + $0x814] ss:$12 sps:$4 sm:$0xff]  }
 0x266   :  { %5574 = vmatpush3.bf16.msra.mxu1 %v6419_v60 }
 0x267   :  { %5575 = vmatprep.subr.bf16.mxu1 %v6423_v3  ;;  %v6458_v3 = vld [vmem:[#allocation7 + $0x810] ss:$12 sps:$4 sm:$0xff]  }
 0x268   :  { %4534 = vmatpush1.bf16.msra.mxu0 %v6388_v27 }
 0x269   :  { %4535 = vmatprep.subr.bf16.mxu0 %v6393_v28  ;;  %v6463_v28 = vld [vmem:[#allocation7 + $0x82c] ss:$12 sps:$4 sm:$0xff]  }
 0x26a   :  { %5576 = vmatpush3.bf16.msra.mxu1 %v6424_v13 }
 0x26b   :  { %5577 = vmatprep.subr.bf16.mxu1 %v6428_v29 }
 0x26c   :  { %4536 = vmatpush1.bf16.msra.mxu0 %v6391_v30 }
 0x26d   :  { %4537 = vmatprep.subr.bf16.mxu0 %v6396_v31 }
 0x26e   :  { %5578 = vmatpush3.bf16.msra.mxu1 %v6429_v32  ;;  %v6461_v32 = vld [vmem:[#allocation7 + $0x828] ss:$12 sps:$4 sm:$0xff]  }
 0x26f   :  { %5579 = vmatprep.subr.bf16.mxu1 %v6433_v33  ;;  %v6466_v33 = vld [vmem:[#allocation7 + $0x844] ss:$12 sps:$4 sm:$0xff]  }
 0x270   :  { %4538 = vmatpush1.bf16.msra.mxu0 %v6394_v35  ;;  %v6464_v35 = vld [vmem:[#allocation7 + $0x840] ss:$12 sps:$4 sm:$0xff]  }
 0x271   :  { %4539 = vmatprep.subr.bf16.mxu0 %v6399_v36  ;;  %v6469_v36 = vld [vmem:[#allocation7 + $0x85c] ss:$12 sps:$4 sm:$0xff]  }
 0x272   :  { %5580 = vmatpush3.bf16.msra.mxu1 %v6434_v37  ;;  %v6467_v37 = vld [vmem:[#allocation7 + $0x858] ss:$12 sps:$4 sm:$0xff]  }
 0x273   :  { %5581 = vmatprep.subr.bf16.mxu1 %v6438_v38  ;;  %v6472_v38 = vld [vmem:[#allocation7 + $0x874] ss:$12 sps:$4 sm:$0xff]  }
 0x274   :  { %4540 = vmatpush1.bf16.msra.mxu0 %v6397_v39  ;;  %v6470_v39 = vld [vmem:[#allocation7 + $0x870] ss:$12 sps:$4 sm:$0xff]  }
 0x275   :  { %4541 = vmatprep.subr.bf16.mxu0 %v6402_v40  ;;  %v6475_v40 = vld [vmem:[#allocation7 + $0x88c] ss:$12 sps:$4 sm:$0xff]  }
 0x276   :  { %5582 = vmatpush3.bf16.msra.mxu1 %v6439_v41  ;;  %v6473_v41 = vld [vmem:[#allocation7 + $0x888] ss:$12 sps:$4 sm:$0xff]  }
 0x278   :  { %4542 = vmatpush1.bf16.msra.mxu0 %v6400_v42  ;;  %v6478_v42 = vld [vmem:[#allocation7 + $0x8a4] ss:$12 sps:$4 sm:$0xff]  }
 0x279   :  { %4543 = vmatprep.subr.bf16.mxu0 %v6407_v43  ;;  %v6476_v43 = vld [vmem:[#allocation7 + $0x8a0] ss:$12 sps:$4 sm:$0xff]  }
 0x27c   :  { %4544 = vmatpush1.bf16.msra.mxu0 %v6405_v44  ;;  %v6481_v44 = vld [vmem:[#allocation7 + $0x8bc] ss:$12 sps:$4 sm:$0xff]  }
 0x27d   :  { %4545 = vmatprep.subr.bf16.mxu0 %v6412_v45  ;;  %v2800_v45 = vld [vmem:[%s6803_s4] sm:$0x7]  ;;  %s6593_s4 = smov [#allocation8]  }
 0x27e   :  { %s4868_s14 = sshll.u32 %s6593_s4, 4  ;;  %s4869_s14 = int_to_ptr.vmem [resolvable:$true] %s4868_s14 }
 0x27f   :  { %s6555_s15 = scalar_lea.vmem %s4869_s14, 768  ;;  %p6560_p11 = scmp.lt.s32.totalorder %s4869_s14, %s4869_s14 }
 0x280   :  { %4546 = vmatpush1.bf16.msra.mxu0 %v6410_v46  ;;  %v6479_v46 = vld [vmem:[#allocation7 + $0x8b8] ss:$12 sps:$4 sm:$0xff]   ;;  %p6556_p10 = scmp.ne.s32.totalorder %s4869_s14, %s6555_s15  ;;  %p6561_p12 = scmp.lt.s32.totalorder %s6555_s15, %s6555_s15 }
 0x281   :  { %4547 = vmatprep.subr.bf16.mxu0 %v6417_v47  ;;  %v6484_v47 = vld [vmem:[#allocation7 + $0x8d4] ss:$12 sps:$4 sm:$0xff]  }
 0x282   :  { %p6562_p13 = por %p6561_p12, %p6560_p11 }
 0x284   :  { %4548 = vmatpush1.bf16.msra.mxu0 %v6415_v48  ;;  %v2813_v48 = vrot.slane %v2800_v45, %v6726_v51  ;;  %p6563_p0 = pnand %p6562_p13, %p6556_p10 }
 0x285   :  { %4549 = vmatprep.subr.bf16.mxu0 %v6422_v50 }
 0x288   :  { %4550 = vmatpush1.bf16.msra.mxu0 %v6420_v53  ;;  %v6482_v53 = vld [vmem:[#allocation7 + $0x8d0] ss:$12 sps:$4 sm:$0xff]  }
 0x289   :  { %4551 = vmatprep.subr.bf16.mxu0 %v6427_v14 }
 0x28c   :  { %4552 = vmatpush1.bf16.msra.mxu0 %v6425_v55  ;;  %v2371_v63 = vpop.f32.mrb[12].mxu1  ;;  %v6487_v55 = vld [vmem:[#allocation7 + $0x8ec] ss:$12 sps:$4 sm:$0xff]  }
 0x28d   :  { %v5609_v1 = vadd.f32 %v2371_v63, %v407_v58  ;;  %v2373_v2 = vpop.f32.mrb[13].mxu1  ;;  %4553 = vmatprep.subr.bf16.mxu0 %v6432_v62 }
 0x28e   :  { %v5610_v5 = vadd.f32 %v2373_v2, %v411_v57  ;;  %v2375_v6 = vpop.f32.mrb[14].mxu1 }
 0x28f   :  { %v2390_v7 = vmax.f32 %v5609_v1, 0.0  ;;  %v5611_v8 = vadd.f32 %v2375_v6, %v407_v58  ;;  %v2377_v9 = vpop.f32.mrb[15].mxu1 }
 0x290   :  { %v2391_v10 = vmax.f32 %v5610_v5, 0.0  ;;  %v5612_v11 = vadd.f32 %v2377_v9, %v411_v57  ;;  %4554 = vmatpush1.bf16.msra.mxu0 %v6430_v0 }
 0x291   :  { %v2402_v52 = vmax.f32 %v5611_v8, 0.0  ;;  %4555 = vmatprep.subr.bf16.mxu0 %v6437_v4  ;;  %v6485_v4 = vld [vmem:[#allocation7 + $0x8e8] ss:$12 sps:$4 sm:$0xff]  }
 0x292   :  { %v2403_v34 = vmax.f32 %v5612_v11, 0.0 }
 0x293   :  { %v6773_v26 = vpack.c.bf16 %v2402_v52, %v2390_v7 }
 0x294   :  { %v2415_v16 = vpack.c.bf16 %v2403_v34, %v2391_v10  ;;  %4556 = vmatpush1.bf16.msra.mxu0 %v6435_v12 }
 0x295   :  { %4568 = vmatprep.subr.bf16.mxu0 %v6442_v49 }
 0x296   :  { %4848 = vmatprep.mubr.bf16.mxu1 %v2415_v16 }
 0x297   :  { %4558 = vmatmul.mubr.bf16.vlgmr.msra.gmra.mrb[8].mxu0 %v6748_v56  ;;  %4849 = vmatmul.mubr.bf16.vlgmr.msra.gmra.mrb[36].mxu1 %v6773_v26  ;;  %v6455_v56 = vld [vmem:[#allocation7 + $0x7f8] ss:$12 sps:$4 sm:$0xff]  }
 0x298   :  { %4569 = vmatpush1.bf16.msra.mxu0 %v6440_v17  ;;  %4600 = vmatprep.mubr.bf16.mxu0 %v2415_v16 }
 0x299   :  { %4570 = vmatprep.subr.bf16.mxu0 %v6445_v18 }
 0x29c   :  { %4571 = vmatpush1.bf16.msra.mxu0 %v6443_v19 }
 0x29d   :  { %4572 = vmatprep.subr.bf16.mxu0 %v6448_v21 }
 0x2a0   :  { %4573 = vmatpush1.bf16.msra.mxu0 %v6446_v22 }
 0x2a1   :  { %4574 = vmatprep.subr.bf16.mxu0 %v6451_v23 }
 0x2a4   :  { %4575 = vmatpush1.bf16.msra.mxu0 %v6449_v24 }
 0x2a5   :  { %4576 = vmatprep.subr.bf16.mxu0 %v6454_v15 }
 0x2a8   :  { %4577 = vmatpush1.bf16.msra.mxu0 %v6452_v61 }
 0x2a9   :  { %4578 = vmatprep.subr.bf16.mxu0 %v6457_v25 }
 0x2ac   :  { %4579 = vmatpush1.bf16.msra.mxu0 %v6455_v56  ;;  %v5473_v60 = vpop.f32.mrb[16].mxu1 }
 0x2ad   :  { %v5474_v27 = vpop.f32.mrb[17].mxu1  ;;  %4580 = vmatprep.subr.bf16.mxu0 %v6460_v59 }
 0x2ae   :  { %v5475_v13 = vadd.f32 %v5474_v27, %v5473_v60  ;;  %v5476_v29 = vpop.f32.mrb[18].mxu1 }
 0x2af   :  { %v5477_v30 = vpop.f32.mrb[19].mxu1 }
 0x2b0   :  { %4581 = vmatpush1.bf16.msra.mxu0 %v6458_v3  ;;  %v5478_v31 = vadd.f32 %v5477_v30, %v5476_v29  ;;  %v4646_v58 = vadd.f32 %v5475_v13, %v2813_v48 }
 0x2b1   :  { %4582 = vmatprep.subr.bf16.mxu0 %v6463_v28 }
 0x2b2   :  { %v4649_v0 = vadd.f32 %v5478_v31, %v2813_v48  ;;  %v2805_v31 = vrot.slane %v2800_v45, %v6698_v20 }
 0x2b4   :  { %4583 = vmatpush1.bf16.msra.mxu0 %v6461_v32  ;;  %v2809_v32 = vrot.slane %v2800_v45, %v6701_v54 }
 0x2b5   :  { %4584 = vmatprep.subr.bf16.mxu0 %v6466_v33 }
 0x2b8   :  { %4585 = vmatpush1.bf16.msra.mxu0 %v6464_v35 }
 0x2b9   :  { %4586 = vmatprep.subr.bf16.mxu0 %v6469_v36 }
 0x2bc   :  { %4587 = vmatpush1.bf16.msra.mxu0 %v6467_v37 }
 0x2bd   :  { %4588 = vmatprep.subr.bf16.mxu0 %v6472_v38 }
 0x2c0   :  { %4589 = vmatpush1.bf16.msra.mxu0 %v6470_v39 }
 0x2c1   :  { %4590 = vmatprep.subr.bf16.mxu0 %v6475_v40 }
 0x2c4   :  { %4591 = vmatpush1.bf16.msra.mxu0 %v6473_v41 }
 0x2c5   :  { %4592 = vmatprep.subr.bf16.mxu0 %v6478_v42 }
 0x2c8   :  { %4593 = vmatpush1.bf16.msra.mxu0 %v6476_v43 }
 0x2c9   :  { %4594 = vmatprep.subr.bf16.mxu0 %v6481_v44 }
 0x2cc   :  { %4595 = vmatpush1.bf16.msra.mxu0 %v6479_v46  ;;  %v5495_v50 = vpop.f32.mrb[20].mxu1 }
 0x2cd   :  { %v5496_v14 = vpop.f32.mrb[21].mxu1  ;;  %4596 = vmatprep.subr.bf16.mxu0 %v6484_v47 }
 0x2ce   :  { %v5497_v62 = vadd.f32 %v5496_v14, %v5495_v50  ;;  %v5498_v57 = vpop.f32.mrb[22].mxu1 }
 0x2cf   :  { %v5499_v63 = vpop.f32.mrb[23].mxu1 }
 0x2d0   :  { %v4687_v1 = vadd.f32 %v5497_v62, %v4646_v58  ;;  %4597 = vmatpush1.bf16.msra.mxu0 %v6482_v53  ;;  %v5500_v2 = vadd.f32 %v5499_v63, %v5498_v57 }
 0x2d1   :  { %4598 = vmatprep.subr.bf16.mxu0 %v6487_v55 }
 0x2d2   :  { %v4690_v5 = vadd.f32 %v5500_v2, %v4649_v0 }
 0x2d4   :  { %4599 = vmatpush1.bf16.msra.mxu0 %v6485_v4 }
 0x2d7   :  { %4601 = vmatmul.mubr.bf16.vlgmr.msra.gmra.mrb[8].mxu0 %v6773_v26 }
 0x2ec   :  { %v5517_v51 = vpop.f32.mrb[24].mxu1 }
 0x2ed   :  { %v5518_v6 = vpop.f32.mrb[25].mxu1 }
 0x2ee   :  { %v5519_v7 = vadd.f32 %v5518_v6, %v5517_v51  ;;  %v5520_v8 = vpop.f32.mrb[26].mxu1 }
 0x2ef   :  { %v5521_v9 = vpop.f32.mrb[27].mxu1 }
 0x2f0   :  { %v4728_v10 = vadd.f32 %v5519_v7, %v4687_v1  ;;  %v5522_v11 = vadd.f32 %v5521_v9, %v5520_v8 }
 0x2f2   :  { %v4731_v12 = vadd.f32 %v5522_v11, %v4690_v5 }
 0x30c   :  { %v5539_v52 = vpop.f32.mrb[28].mxu1 }
 0x30d   :  { %v5540_v49 = vpop.f32.mrb[29].mxu1 }
 0x30e   :  { %v5541_v34 = vadd.f32 %v5540_v49, %v5539_v52  ;;  %v5542_v16 = vpop.f32.mrb[30].mxu1 }
 0x30f   :  { %v5543_v17 = vpop.f32.mrb[31].mxu1 }
 0x310   :  { %v4769_v18 = vadd.f32 %v5541_v34, %v4728_v10  ;;  %v5544_v19 = vadd.f32 %v5543_v17, %v5542_v16 }
 0x312   :  { %v4772_v21 = vadd.f32 %v5544_v19, %v4731_v12 }
 0x32c   :  { %v5561_v22 = vpop.f32.mrb[32].mxu1 }
 0x32d   :  { %v5562_v23 = vpop.f32.mrb[33].mxu1 }
 0x32e   :  { %v5563_v24 = vadd.f32 %v5562_v23, %v5561_v22  ;;  %v5564_v26 = vpop.f32.mrb[34].mxu1 }
 0x32f   :  { %v5565_v15 = vpop.f32.mrb[35].mxu1 }
 0x330   :  { %v4810_v61 = vadd.f32 %v5563_v24, %v4769_v18  ;;  %v5566_v25 = vadd.f32 %v5565_v15, %v5564_v26 }
 0x332   :  { %v4813_v56 = vadd.f32 %v5566_v25, %v4772_v21 }
 0x36a   :  { %v5583_v59 = vpop.f32.mrb[36].mxu1 }
 0x36b   :  { %v5584_v60 = vpop.f32.mrb[37].mxu1 }
 0x36c   :  { %v5585_v3 = vadd.f32 %v5584_v60, %v5583_v59  ;;  %v5586_v27 = vpop.f32.mrb[38].mxu1 }
 0x36d   :  { %v5587_v28 = vpop.f32.mrb[39].mxu1 }
 0x36e   :  { %v4851_v13 = vadd.f32 %v5585_v3, %v4810_v61  ;;  %v5588_v29 = vadd.f32 %v5587_v28, %v5586_v27 }
 0x370   :  { %4859 = vst [vmem:[#allocation8 + $0x10] sm:$0xff] %v4851_v13  ;;  %v4854_v30 = vadd.f32 %v5588_v29, %v4813_v56 }
 0x372   :  { %4862 = vst [vmem:[#allocation8 + $0x28] sm:$0xff] %v4854_v30 }
 0x3aa   :  { %v4602_v33 = vpop.f32.mrb[8].mxu0 }
 0x3ab   :  { %v5613_v35 = vadd.f32 %v4602_v33, %v2805_v31  ;;  %v4604_v36 = vpop.f32.mrb[9].mxu0 }
 0x3ac   :  { %v5614_v37 = vadd.f32 %v4604_v36, %v2809_v32  ;;  %v4606_v38 = vpop.f32.mrb[10].mxu0 }
 0x3ad   :  { %4857 = vst [vmem:[#allocation8] sm:$0xff] %v5613_v35  ;;  %v5615_v39 = vadd.f32 %v4606_v38, %v2805_v31  ;;  %v4608_v40 = vpop.f32.mrb[11].mxu0 }
 0x3ae   :  { %4858 = vst [vmem:[#allocation8 + $0x8] sm:$0xff] %v5614_v37  ;;  %v5616_v41 = vadd.f32 %v4608_v40, %v2809_v32 }
 0x3af   :  { %4860 = vst [vmem:[#allocation8 + $0x18] sm:$0xff] %v5615_v39 }
 0x3b0   :  { %4861 = vst [vmem:[#allocation8 + $0x20] sm:$0xff] %v5616_v41 }
 0x3b1   :  { %6566 = shalt.err (!%p6563_p0)
}
 0x3b2   :  { %s6567_s19 = scalar_lea.hbm %s6804_s5, 768 }
 0x3b3   :  { %p6568_p1 = scmp.ne.s32.totalorder %s6804_s5, %s6567_s19  ;;  %p6571_p2 = scmp.lt.u32.totalorder %s6567_s19, %s6804_s5 }
 0x3b5   :  { %p6573_p3 = pnand %p6571_p2, %p6568_p1 }
 0x3b7   :  { %6576 = shalt.err (!%p6573_p3)
}
 0x3b8   :  { %4874 = dma.vmem_to_hbm [thread:$0]  %s4869_s14, 768, %s6804_s5, [#allocation4], %s6587_s1, %s6587_s1, %s6588_s17  }
 0x3b9   :  { %6581 = dma.done.wait [#allocation4], 768  }
 0x3ba   :  { %6582 = vsyncadd [#allocation4], 4294966528 }
 0x3bb   :  { %4878 = vsyncpa [#allocation3], 1 }
 0x3bc   :  { %4879 = vsyncpa [#allocation6], 1 }
 0x3bd   :  { %4880 = vsyncpa [#allocation4], 1 }

</bundles_post_ra>
